<compile_context>
chip_gen: v7x
topology: tpu7x:2x2x1
jax: 0.10.0
libtpu: 0.0.40
codegen_flags: <defaults>
</compile_context>

<pallas_src>
import jax
import jax.numpy as jnp
from jax import lax
from jax.experimental import pallas as pl
from jax.experimental.pallas import tpu as pltpu

_MIB = 1024 * 1024


def _hgcn_kernel(a_ref, xt_ref, invdeg_ref, bsrc_ref, rstt_ref):
    d = pl.program_id(1)
    e = pl.program_id(2)

    a = a_ref[...].astype(jnp.bfloat16)      # (N_src, TD) 0/1 adjacency tile (int8 -> bf16, exact)
    xt = xt_ref[...]                         # (TF, N_src) bf16 source-feature tile (transposed)

    # ---- forward etype: rst^T[f, dst] = sum_src X[src, f] * A[src, dst], * 1/clamp(in_deg) ----
    rst_t = jnp.dot(xt, a, preferred_element_type=jnp.float32)     # (TF, TD) f32, MXU-native
    rst_t = rst_t * invdeg_ref[...]                                # (1, TD) lane-dense broadcast
    # rst of the LAST etype is returned; the block index (f, d) is invariant across the
    # innermost e axis, so the final e overwrite is what gets written back to HBM.
    rstt_ref[...] = rst_t

    # ---- backward etype: bsrc[src, f] += A @ rst == A (N_src,TD) . rst^T (TF,TD)^T ----
    back = lax.dot_general(a, rst_t.astype(jnp.bfloat16),
                           (((1,), (1,)), ((), ())),               # rhs-transposed (q @ k.T form)
                           preferred_element_type=jnp.float32)     # (N_src, TF) f32

    @pl.when((d == 0) & (e == 0))
    def _():
        bsrc_ref[...] = jnp.zeros_like(bsrc_ref)

    bsrc_ref[...] += back


def _vmem_capacity_bytes():
    try:
        return int(pltpu.get_tpu_info().vmem_capacity_bytes)
    except Exception:
        pass
    try:
        kind = jax.devices()[0].device_kind.lower()
        if "v7" in kind:
            return 64 * _MIB
    except Exception:
        pass
    return 128 * _MIB


def _parallel_tensorcores():
    try:
        kind = jax.devices()[0].device_kind.lower()
    except Exception:
        return 1
    return 2 if ("v7" in kind or "v5p" in kind or "v4" in kind) else 1


def _aligned_tile(dim, desired):
    """Largest 128-aligned divisor of `dim` that is <= desired (falls back to the full dim)."""
    if dim <= desired:
        return dim
    t = (desired // 128) * 128
    while t >= 128:
        if dim % t == 0:
            return t
        t -= 128
    return dim


def _pick_tiles(n_src, n_dst, f_dim, vmem_budget, parallel_cores):
    def footprint(td, tf):
        return (2 * n_src * td * 1        # adjacency int8, double-buffered
                + 2 * tf * n_src * 2      # features^T bf16
                + 2 * n_src * tf * 4      # bsrc f32 accumulator block
                + 2 * tf * td * 4         # rst^T f32 output block
                + 2 * 8 * td * 4)         # invdeg (1, td) padded to 8 sublanes

    tf = _aligned_tile(f_dim, 256)
    td = _aligned_tile(n_dst, 512)

    # 2-TC chips (v7x megacore): keep >= 2 feature tiles so both cores get work.
    if parallel_cores > 1 and f_dim // tf < parallel_cores:
        smaller = _aligned_tile(f_dim, max(128, f_dim // parallel_cores))
        if f_dim // smaller >= parallel_cores:
            tf = smaller

    def shrink(dim, cur):
        nxt = _aligned_tile(dim, cur - 128)
        return nxt if nxt < cur else cur

    while footprint(td, tf) > vmem_budget:
        new_td = shrink(n_dst, td)
        if new_td < td:
            td = new_td
            continue
        new_tf = shrink(f_dim, tf)
        if new_tf < tf:
            tf = new_tf
            continue
        break
    return td, tf


def hgcn_layer_general(adjs, feat_src, norm_2=-1, *, td=None, tf=None):
    """adjs: [E, N_src, N_dst] 0/1; feat_src: [N_src, F]. Returns (bsrc, rst_last_etype)."""
    E, n_src, n_dst = adjs.shape
    f_dim = feat_src.shape[1]

    vmem_cap = _vmem_capacity_bytes()
    vmem_limit = int(min(vmem_cap * 3 // 4, 112 * _MIB))
    if td is None or tf is None:
        td_auto, tf_auto = _pick_tiles(n_src, n_dst, f_dim, vmem_limit - 4 * _MIB,
                                       _parallel_tensorcores())
        td = td_auto if td is None else min(td, n_dst)
        tf = tf_auto if tf is None else min(tf, f_dim)
    assert n_dst % td == 0 and f_dim % tf == 0, "pad N_dst / F to tile multiples"
    # TODO(synk): DGL's sparse COO message passing is realized as dense 0/1 adjacency matmuls;
    # a true sparse gather/scatter kernel is out of scope here.

    # Degree terms computed directly on the input with f32 accumulation (no f32 adjacency copy):
    deg_dst = jnp.maximum(jnp.sum(adjs, axis=1, dtype=jnp.float32), 1.0)          # (E, N_dst)
    inv_deg_dst = (1.0 / deg_dst)[:, None, :]                                      # (E, 1, N_dst)
    deg_b = jnp.sum(jnp.maximum(jnp.sum(adjs, axis=2, dtype=jnp.float32), 1.0), 0)  # (N_src,)
    norm_src = jnp.power(deg_b, jnp.float32(norm_2))[:, None]                      # (N_src, 1)

    a_i8 = adjs.astype(jnp.int8)                        # 0/1 adjacency streamed as int8
    xt_bf16 = feat_src.astype(jnp.bfloat16).T           # features pre-transposed -> (F, N_src)

    grid_f = f_dim // tf
    grid = (grid_f, n_dst // td, E)

    flops = 4 * E * n_src * n_dst * f_dim
    bytes_accessed = (grid_f * E * n_src * n_dst * 1    # int8 adjacency, re-streamed per F tile
                      + n_src * f_dim * 2               # features^T
                      + n_src * f_dim * 4               # bsrc writeback
                      + n_dst * f_dim * 4               # rst^T writeback (once per (f, d))
                      + grid_f * E * n_dst * 4)         # invdeg side input
    cost = pl.CostEstimate(flops=int(flops), transcendentals=0,
                           bytes_accessed=int(bytes_accessed))

    bsrc_raw, rst_t = pl.pallas_call(
        _hgcn_kernel,
        out_shape=(
            jax.ShapeDtypeStruct((n_src, f_dim), jnp.float32),
            jax.ShapeDtypeStruct((f_dim, n_dst), jnp.float32),
        ),
        grid_spec=pltpu.PrefetchScalarGridSpec(
            num_scalar_prefetch=0,
            grid=grid,
            in_specs=[
                pl.BlockSpec((None, n_src, td), lambda f, d, e: (e, 0, d)),   # adjacency (int8)
                pl.BlockSpec((tf, n_src), lambda f, d, e: (f, 0)),            # features^T (bf16)
                pl.BlockSpec((None, 1, td), lambda f, d, e: (e, 0, d)),       # 1/clamp(in_deg_dst)
            ],
            out_specs=(
                pl.BlockSpec((n_src, tf), lambda f, d, e: (0, f)),            # bsrc (resident acc)
                pl.BlockSpec((tf, td), lambda f, d, e: (f, d)),               # rst^T (last etype)
            ),
        ),
        compiler_params=pltpu.CompilerParams(
            dimension_semantics=("parallel", "arbitrary", "arbitrary"),
            vmem_limit_bytes=vmem_limit,
        ),
        cost_estimate=cost,
    )(a_i8, xt_bf16, inv_deg_dst)

    bsrc = bsrc_raw * norm_src        # degb ** norm_2 applied as a fused XLA epilogue
    rst = rst_t.T                     # (N_dst, F); one cheap XLA transpose
    return bsrc, rst


def hgcn_layer_ref(adjs, feat_src, norm_2=-1):
    """Pure-JAX f32 reference mirroring the PyTorch/DGL forward."""
    E, n_src, _ = adjs.shape
    f_dim = feat_src.shape[1]
    bsrc = jnp.zeros((n_src, f_dim), jnp.float32)
    degb = jnp.zeros((n_src, 1), jnp.float32)
    rst = None
    for e in range(E):
        a = adjs[e].astype(jnp.float32)
        rst = a.T @ feat_src.astype(jnp.float32)
        deg_dst = jnp.maximum(jnp.sum(a, axis=0), 1.0)[:, None]
        rst = rst * (1.0 / deg_dst)
        bsrc = bsrc + a @ rst
        degb = degb + jnp.maximum(jnp.sum(a, axis=1), 1.0)[:, None]
    bsrc = bsrc * jnp.power(degb, float(norm_2))
    return bsrc, rst


if __name__ == "__main__":
    key = jax.random.PRNGKey(0)
    k_adj, k_feat = jax.random.split(key)

    # small synthetic hetero-graph (tile-aligned): 3 etypes, 128 src, 512 dst, 256 features
    E, N_SRC, N_DST, F_DIM = 3, 128, 512, 256
    adjs = jax.random.bernoulli(k_adj, p=0.1, shape=(E, N_SRC, N_DST)).astype(jnp.float32)
    feat_src = jax.random.normal(k_feat, (N_SRC, F_DIM), dtype=jnp.float32)

    bsrc, rst = hgcn_layer_general(adjs, feat_src, norm_2=-1)
    jax.block_until_ready((bsrc, rst))

    bsrc_ref, rst_ref = hgcn_layer_ref(adjs, feat_src, norm_2=-1)
    # bf16 feature/intermediate streaming introduces ~2^-8 relative drift; tolerances loosened.
    assert jnp.allclose(bsrc, bsrc_ref, atol=1e-2, rtol=2e-2), "bsrc mismatch"
    assert jnp.allclose(rst, rst_ref, atol=1e-2, rtol=2e-2), "rst mismatch"

    print("KERNEL_OK")
</pallas_src>

<mosaic_0001>
module attributes {stable_mosaic.version = 11 : i64} {
  func.func @_hgcn_kernel(%arg0: i32, %arg1: i32, %arg2: i32, %arg3: memref<1x128x512xi8, #tpu.memory_space<vmem>>, %arg4: memref<256x128xbf16, #tpu.memory_space<vmem>>, %arg5: memref<1x1x512xf32, #tpu.memory_space<vmem>>, %arg6: memref<128x256xf32, #tpu.memory_space<vmem>>, %arg7: memref<256x512xf32, #tpu.memory_space<vmem>>) attributes {dimension_semantics = [#tpu.dimension_semantics<parallel>, #tpu.dimension_semantics<arbitrary>, #tpu.dimension_semantics<arbitrary>], iteration_bounds = array<i64: 1, 1, 3>, scalar_prefetch = 0 : i64, scratch_operands = 0 : i64, tpu.core_type = #tpu.core_type<tc>, window_params = [{transform_indices = @transform_0, window_bounds = array<i64: 1, 128, 512>}, {transform_indices = @transform_1, window_bounds = array<i64: 256, 128>}, {transform_indices = @transform_2, window_bounds = array<i64: 1, 1, 512>}, {transform_indices = @transform_3, window_bounds = array<i64: 128, 256>}, {transform_indices = @transform_4, window_bounds = array<i64: 256, 512>}]} {
    %c0 = arith.constant 0 : index
    %c0_0 = arith.constant 0 : index
    %c0_1 = arith.constant 0 : index
    %0 = vector.load %arg3[%c0, %c0_0, %c0_1] : memref<1x128x512xi8, #tpu.memory_space<vmem>>, vector<1x128x512xi8>
    %1 = vector.shape_cast %0 : vector<1x128x512xi8> to vector<128x512xi8>
    %2 = arith.sitofp %1 : vector<128x512xi8> to vector<128x512xbf16>
    %c0_2 = arith.constant 0 : index
    %c0_3 = arith.constant 0 : index
    %3 = vector.load %arg4[%c0_2, %c0_3] : memref<256x128xbf16, #tpu.memory_space<vmem>>, vector<256x128xbf16>
    %cst = arith.constant dense<0.000000e+00> : vector<256x512xf32>
    %4 = tpu.matmul %3, %2, %cst {dimension_numbers = #tpu.dot_dimension_numbers<[1], [0], [0], [1], [0, 0, 1, 1], [], []>} : vector<256x128xbf16>, vector<128x512xbf16>, vector<256x512xf32> -> vector<256x512xf32>
    %c0_4 = arith.constant 0 : index
    %c0_5 = arith.constant 0 : index
    %c0_6 = arith.constant 0 : index
    %5 = vector.load %arg5[%c0_4, %c0_5, %c0_6] : memref<1x1x512xf32, #tpu.memory_space<vmem>>, vector<1x1x512xf32>
    %6 = vector.shape_cast %5 : vector<1x1x512xf32> to vector<1x512xf32>
    %7 = vector.broadcast %6 : vector<1x512xf32> to vector<256x512xf32>
    %8 = arith.mulf %4, %7 : vector<256x512xf32>
    %c0_7 = arith.constant 0 : index
    %c0_8 = arith.constant 0 : index
    %9 = vector.load %arg7[%c0_7, %c0_8] : memref<256x512xf32, #tpu.memory_space<vmem>>, vector<256x512xf32>
    tpu.vector_store %arg7[%c0_7, %c0_8], %8 {strides = array<i32>} : memref<256x512xf32, #tpu.memory_space<vmem>>, vector<256x512xf32>,
    %10 = arith.truncf %8 : vector<256x512xf32> to vector<256x512xbf16>
    %cst_9 = arith.constant dense<0.000000e+00> : vector<128x256xf32>
    %11 = tpu.matmul %2, %10, %cst_9 {dimension_numbers = #tpu.dot_dimension_numbers<[1], [1], [0], [0], [0, 0, 1, 0], [], []>} : vector<128x512xbf16>, vector<256x512xbf16>, vector<128x256xf32> -> vector<128x256xf32>
    %c0_i32 = arith.constant 0 : i32
    %12 = arith.cmpi eq, %arg1, %c0_i32 : i32
    %c0_i32_10 = arith.constant 0 : i32
    %13 = arith.cmpi eq, %arg2, %c0_i32_10 : i32
    %14 = arith.andi %12, %13 : i1
    %15 = arith.extui %14 : i1 to i32
    %c0_i32_11 = arith.constant 0 : i32
    %16 = arith.cmpi ne, %15, %c0_i32_11 : i32
    scf.if %16 {
      %cst_16 = arith.constant 0.000000e+00 : f32
      %20 = vector.broadcast %cst_16 : f32 to vector<128x256xf32>
      %c0_17 = arith.constant 0 : index
      %c0_18 = arith.constant 0 : index
      %21 = vector.load %arg6[%c0_17, %c0_18] : memref<128x256xf32, #tpu.memory_space<vmem>>, vector<128x256xf32>
      tpu.vector_store %arg6[%c0_17, %c0_18], %20 {strides = array<i32>} : memref<128x256xf32, #tpu.memory_space<vmem>>, vector<128x256xf32>,
    } else {
    }
    %c0_12 = arith.constant 0 : index
    %c0_13 = arith.constant 0 : index
    %17 = vector.load %arg6[%c0_12, %c0_13] : memref<128x256xf32, #tpu.memory_space<vmem>>, vector<128x256xf32>
    %18 = arith.addf %17, %11 : vector<128x256xf32>
    %c0_14 = arith.constant 0 : index
    %c0_15 = arith.constant 0 : index
    %19 = vector.load %arg6[%c0_14, %c0_15] : memref<128x256xf32, #tpu.memory_space<vmem>>, vector<128x256xf32>
    tpu.vector_store %arg6[%c0_14, %c0_15], %18 {strides = array<i32>} : memref<128x256xf32, #tpu.memory_space<vmem>>, vector<128x256xf32>,
    return
  }
  func.func @transform_0(%arg0: i32, %arg1: i32, %arg2: i32) -> (i32, i32, i32) {
    %c0_i32 = arith.constant 0 : i32
    %c0_i32_0 = arith.constant 0 : i32
    return %arg2, %c0_i32, %arg1 : i32, i32, i32
  }
  func.func @transform_1(%arg0: i32, %arg1: i32, %arg2: i32) -> (i32, i32) {
    %c0_i32 = arith.constant 0 : i32
    %c0_i32_0 = arith.constant 0 : i32
    return %arg0, %c0_i32 : i32, i32
  }
  func.func @transform_2(%arg0: i32, %arg1: i32, %arg2: i32) -> (i32, i32, i32) {
    %c0_i32 = arith.constant 0 : i32
    %c0_i32_0 = arith.constant 0 : i32
    return %arg2, %c0_i32, %arg1 : i32, i32, i32
  }
  func.func @transform_3(%arg0: i32, %arg1: i32, %arg2: i32) -> (i32, i32) {
    %c0_i32 = arith.constant 0 : i32
    %c0_i32_0 = arith.constant 0 : i32
    return %c0_i32, %arg0 : i32, i32
  }
  func.func @transform_4(%arg0: i32, %arg1: i32, %arg2: i32) -> (i32, i32) {
    %c0_i32 = arith.constant 0 : i32
    return %arg0, %arg1 : i32, i32
  }
}

</mosaic_0001>

<bundles_post_ra>
// kernel: tpu_custom_call.1
= control target key start
LH: loop header
LB: loop body
LE: loop exit
PB: predicated region body
PF: predicated region fallthrough
CT: control target
= control target key end

     0   :  { %s2883_s0 = inlined_call_operand.hbm [shape: s8[3,128,512], index: 0, kind: input, shape index: {}]   ;;  %s2884_s1 = inlined_call_operand.hbm [shape: bf16[256,128], index: 1, kind: input, shape index: {}]   ;;  %s2885_s2 = inlined_call_operand.hbm [shape: f32[3,1,512], index: 2, kind: input, shape index: {}]   ;;  %s2886_s3 = inlined_call_operand.hbm [shape: f32[128,256], index: 3, kind: output, shape index: {0}]   ;;  %s2887_s4 = inlined_call_operand.hbm [shape: f32[256,512], index: 4, kind: output, shape index: {1}]  }
   0x1   :  { %2899 = sst [smem:[#allocation16_spill]] %s2883_s0 }
   0x2   :  { %10 = vsyncpa [#allocation3], 0 }
   0x3   :  { %12 = vsyncpa [#allocation3 + $0x1], 0 }
   0x4   :  { %13 = vsyncpa [#allocation6], 0 }
   0x5   :  { %14 = vsyncpa [#allocation4], 0 }
   0x6   :  { %15 = vsyncpa [#allocation10], 0  ;;  %s2151_s15 = smov 0   ;;  %s2153_s16 = smov 0  }
   0x7   :  { %s2155_s17 = smov 0   ;;  %s2157_s18 = smov 0  }
   0x8   :  { %s2159_s19 = smov 0   ;;  %s2161_s20 = smov 0  }
   0x9 LB: > { %s33_s21 = sadd.s32 1, %s2105_s19  ;;  %s49_s22 = sadd.s32 1, %s2097_s17  ;;  %s2109_s20 = sphi %s2161_s20, %s21_s20   ;;  %s2105_s19 = sphi %s2159_s19, %s2921_s19   ;;  %s2101_s18 = sphi %s2157_s18, %s2920_s18   ;;  %s2097_s17 = sphi %s2155_s17, %s2919_s17   ;;  %s2093_s16 = sphi %s2153_s16, %s2918_s16   ;;  %s2089_s15 = sphi %s2151_s15, %s2917_s15  }
   0xa   : > { %p34_p0 = scmp.ge.s32.totalorder %s33_s21, 3  ;;  %p56_p1 = scmp.ne.s32.totalorder %s2097_s17, %s2093_s16 }
   0xb   : > { %p57_p2 = scmp.eq.s32.totalorder %s2109_s20, 0  ;;  %p1820_p4 = scmp.lt.s32.totalorder %s2109_s20, 3 }
   0xc   : > { %s2923_s21 = smov (%p34_p0, %s33_s21), 0  ;;  %s210_s24 = sand.u32 1, %s2109_s20  }
   0xd   : > { %p58_p3 = por %p57_p2, %p56_p1  ;;  %s44_s23 = ssub.s32 %s2105_s19, %s2923_s21 }
   0xe   : > { %p47_p5 = scmp.eq.s32.totalorder %s44_s23, 0  ;;  %s212_s25 = sand.u32 1, %s2097_s17  }
   0xf   : > { %s1757_s26 = sshll.u32 %s2105_s19, 11  ;;  %s1724_s28 = sshll.u32 %s212_s25, 7 }
  0x10   : > { %s2195_s27 = scalar_select %p47_p5, %s2097_s17, %s49_s22  }
  0x11   : > { %s2900_s0 = sld [smem:[#allocation16_spill]]  ;;  %p2204_p6 = pnand %p1820_p4, %p58_p3 }
  0x12   : > { %s214_s7 = scalar_lea.vmem [#allocation2], %s1724_s28  ;;  %s2210_s9 = scalar_lea.sflag [#allocation3], %s210_s24 }
  0x13   : > { %s2901_s6 = scalar_select %p2204_p6, 1, 0 }
  0x14   : > { %s223_s8 = sshll.u32 %s214_s7, 4  ;;  %p2889_p8 = pneg %p2204_p6  ;;  %s2208_s8 = int_to_ptr.vmem [resolvable:$true] %s223_s8 }
  0x17   : > { %s2202_s5 = scalar_lea.hbm %s2900_s0, %s1757_s26  ;;  %s1908_s13 = scalar_lea.hbm %s2900_s0, 6144 }
  0x18   : > { %s1903_s10 = scalar_lea.hbm %s2202_s5, 2048  ;;  %p1909_p11 = scmp.lt.u32.totalorder %s2202_s5, %s2900_s0 }
  0x19   : > { %p1904_p7 = scmp.ne.s32.totalorder %s2202_s5, %s1903_s10  ;;  %p1910_p12 = scmp.lt.u32.totalorder %s1908_s13, %s1903_s10 }
  0x1a   : > { %p1912_p0 = scmp.lt.u32.totalorder %s1903_s10, %s2202_s5 }
  0x1b   : > { %p1906_p9 = pnand %p2889_p8, %p1904_p7  ;;  %p1911_p13 = por %p1910_p12, %p1909_p11 }
  0x1d   : > { %p1907_p10 = pneg %p1906_p9  ;;  %p1913_p1 = por %p1912_p0, %p1911_p13 }
  0x1f   : > { %p1914_p2 = pnand %p1913_p1, %p1907_p10 }
  0x21   : > { %1917 = shalt.err (!%p1914_p2)
}
  0x22   : > { %s1918_s23 = scalar_lea.vmem %s2208_s8, 2048  ;;  %s2111_s24 = smov [#allocation2]  }
  0x23   : > { %p1919_p3 = scmp.ne.s32.totalorder %s2208_s8, %s1918_s23  ;;  %s1923_s26 = sshll.u32 %s2111_s24, 4  ;;  %s1924_s26 = int_to_ptr.vmem [resolvable:$false] %s1923_s26 }
  0x24   : > { %s1925_s28 = scalar_lea.vmem %s1924_s26, 4096  ;;  %p1926_p7 = scmp.lt.s32.totalorder %s2208_s8, %s1924_s26 }
  0x25   : > { %p1921_p4 = pnand %p1919_p3, %p2889_p8  ;;  %p1927_p9 = scmp.lt.s32.totalorder %s1925_s28, %s1918_s23 }
  0x27   : > { %p1922_p5 = pneg %p1921_p4  ;;  %p1928_p11 = por %p1927_p9, %p1926_p7 }
  0x29   : > { %p1929_p12 = pnand %p1928_p11, %p1922_p5 }
  0x2b   : > { %1932 = shalt.err (!%p1929_p12)
}
  0x2c   : > { %s2112_s29 = smov 512   ;;  %s2113_s30 = smov 32  }
  0x2d   : > { %1815 = dma.hbm_to_vmem [thread:$0]  (!%p2204_p6), %s2202_s5, 2048, %s2208_s8, %s2210_s9, %s2112_s29, %s2112_s29, %s2113_s30  }
  0x2e   : > { %s2239_s7 = sadd.s32 4294967295, %s2109_s20   ;;  %p62_p10 = scmp.ne.s32.totalorder %s2093_s16, %s2089_s15 }
  0x2f   : > { %p2888_p13 = scmp.eq.s32.totalorder %s2239_s7, 0  ;;  %p1721_p0 = scmp.ge.s32.totalorder %s2109_s20, 1 }
  0x30   : > { %p181_p1 = scmp.lt.s32.totalorder %s2109_s20, 4  ;;  %s2114_s5 = smov [#allocation5]  }
  0x31   : > { %p2248_p2 = por %p2888_p13, %p62_p10  ;;  %s196_s8 = sshll.u32 %s2114_s5, 4  ;;  %s2258_s8 = int_to_ptr.vmem [resolvable:$true] %s196_s8 }
  0x32   : > { %p2252_p3 = pnand %p1721_p0, %p181_p1  ;;  %s1727_s15 = sshll.u32 %s212_s25, 2 }
  0x33   : > { %s2902_s10 = scalar_select %p2248_p2, 1, 0 }
  0x34   : > { %s2903_s11 = scalar_select %p2252_p3, 1, 0 }
  0x35   : > { %p1808_p4 = pneg %p2252_p3  ;;  %s1758_s13 = sshll.u32 %s2105_s19, 6 }
  0x36   : > { %s237_s14 = scalar_lea.vmem [#allocation7], %s1727_s15  ;;  %s2272_s26 = scalar_lea.hbm %s2885_s2, %s1758_s13 }
  0x37   : > { %p2264_p5 = pnand %p1808_p4, %p2888_p13  ;;  %s247_s22 = sshll.u32 %s237_s14, 4  ;;  %s248_s22 = int_to_ptr.vmem [resolvable:$true] %s247_s22 }
  0x38   : > { %s1933_s30 = scalar_lea.hbm %s2884_s1, 2048 }
  0x39   : > { %p1934_p7 = scmp.ne.s32.totalorder %s2884_s1, %s1933_s30  ;;  %p1935_p9 = pneg %p2264_p5 }
  0x3a   : > { %p1940_p10 = scmp.lt.u32.totalorder %s1933_s30, %s2884_s1 }
  0x3b   : > { %p1936_p11 = pnand %p1935_p9, %p1934_p7 }
  0x3d   : > { %p1937_p12 = pneg %p1936_p11 }
  0x3f   : > { %p1942_p0 = pnand %p1940_p10, %p1937_p12 }
  0x41   : > { %1945 = shalt.err (!%p1942_p0)
}
  0x42   : > { %s1946_s13 = scalar_lea.vmem %s2258_s8, 2048  ;;  %p1954_p8 = scmp.lt.s32.totalorder %s2258_s8, %s2258_s8 }
  0x43   : > { %p1947_p1 = scmp.ne.s32.totalorder %s2258_s8, %s1946_s13  ;;  %p1955_p2 = scmp.lt.s32.totalorder %s1946_s13, %s1946_s13 }
  0x45   : > { %p1949_p4 = pnand %p1947_p1, %p1935_p9  ;;  %p1956_p3 = por %p1955_p2, %p1954_p8 }
  0x47   : > { %p1950_p13 = pneg %p1949_p4 }
  0x49   : > { %p1957_p6 = pnand %p1956_p3, %p1950_p13 }
  0x4b   : > { %1960 = shalt.err (!%p1957_p6)
}
  0x4c   : > { %s2115_s14 = smov 64   ;;  %s2116_s0 = smov 4  }
  0x4d   : > { %1811 = dma.hbm_to_vmem [thread:$0]  (!%p2264_p5), %s2884_s1, 2048, %s2258_s8, [#allocation6], %s2115_s14, %s2115_s14, %s2116_s0  }
  0x4e   : > { %s1961_s28 = scalar_lea.hbm %s2272_s26, 64  ;;  %p2905_p8 = scmp.ne.s32.totalorder %s2901_s6, 0 }
  0x4f   : > { %p1962_p7 = scmp.ne.s32.totalorder %s2272_s26, %s1961_s28  ;;  %s1966_s5 = scalar_lea.hbm %s2885_s2, 192 }
  0x50   : > { %p2906_p13 = pneg %p2905_p8  ;;  %p1967_p3 = scmp.lt.u32.totalorder %s2272_s26, %s2885_s2 }
  0x51   : > { %p1968_p9 = scmp.lt.u32.totalorder %s1966_s5, %s1961_s28  ;;  %p1970_p12 = scmp.lt.u32.totalorder %s1961_s28, %s2272_s26 }
  0x52   : > { %p1964_p6 = pnand %p1962_p7, %p2906_p13 }
  0x53   : > { %p1969_p11 = por %p1968_p9, %p1967_p3 }
  0x54   : > { %p1965_p2 = pneg %p1964_p6 }
  0x55   : > { %p1971_p10 = por %p1970_p12, %p1969_p11 }
  0x57   : > { %p1972_p5 = pnand %p1971_p10, %p1965_p2 }
  0x59   : > { %1975 = shalt.err (!%p1972_p5)
}
  0x5a   : > { %s1976_s8 = scalar_lea.vmem %s248_s22, 64  ;;  %p2907_p1 = pmov %p2906_p13 }
  0x5b   : > { %p1977_p0 = scmp.ne.s32.totalorder %s248_s22, %s1976_s8  ;;  %s2117_s12 = smov [#allocation7]  }
  0x5c   : > { %s1981_s13 = sshll.u32 %s2117_s12, 4  ;;  %s1982_s13 = int_to_ptr.vmem [resolvable:$false] %s1981_s13 }
  0x5d   : > { %p1979_p4 = pnand %p1977_p0, %p2907_p1  ;;  %s1983_s14 = scalar_lea.vmem %s1982_s13, 128 }
  0x5e   : > { %p1984_p13 = scmp.lt.s32.totalorder %s248_s22, %s1982_s13  ;;  %p1985_p6 = scmp.lt.s32.totalorder %s1983_s14, %s1976_s8 }
  0x5f   : > { %p1980_p7 = pneg %p1979_p4 }
  0x60   : > { %p1986_p3 = por %p1985_p6, %p1984_p13 }
  0x62   : > { %p1987_p9 = pnand %p1986_p3, %p1980_p7 }
  0x64   : > { %1990 = shalt.err (!%p1987_p9)
}
  0x65   : > { %1818 = dma.hbm_to_vmem [thread:$0]  (!%p2905_p8), %s2272_s26, 64, %s248_s22, %s2210_s9  }
  0x66   : > { %p2908_p2 = scmp.ne.s32.totalorder %s2903_s11, 0 }
  0x67   : > { %s258_s0 = sand.u32 (!%p2908_p2), 1, %s2239_s7   ;;  %s260_s23 = sand.u32 (!%p2908_p2), 1, %s2093_s16  }
  0x68   : > { %256 = sbr.rel (%p2908_p2) target bundleno = 824 (0x338), region = 32  ;;  %s1731_s24 = sshll.u32 (!%p2908_p2), %s260_s23, 7 }
  0x69   : > { %s259_s28 = scalar_lea.sflag (!%p2908_p2), [#allocation3], %s258_s0  ;;  %s2319_s29 = scalar_lea.vmem (!%p2908_p2), [#allocation2], %s1731_s24 }
  0x6a   : > { %p2909_p11 = scmp.ne.s32.totalorder (!%p2908_p2), %s2902_s10, 0 }
  0x6f   : > { %2068 = dma.done.wait (%p2909_p11), %s259_s28, 2048  }
  0x70   : > { %2070 = vsyncadd (%p2909_p11), %s259_s28, 4294965248  ;;  %p2910_p12 = scmp.eq.s32.totalorder %s2239_s7, 0 }
  0x72   : > { %2072 = dma.done.wait (%p2910_p12), [#allocation6], 2048   ;;  %p2911_p8 = pmov %p2910_p12 }
  0x73   : > { %s2329_s6 = sshll.u32 %s260_s23, 2 }
  0x74   : > { %2074 = vsyncadd (%p2911_p8), [#allocation6], 4294965248  ;;  %s275_s9 = scalar_lea.vmem [#allocation7], %s2329_s6 }
  0x75   : > { %2076 = dma.done.wait (%p2909_p11), %s259_s28, 64  }
  0x76   : > { %2078 = vsyncadd (%p2909_p11), %s259_s28, 4294967232  ;;  %v2118_v0 = vmov 0   ;;  %v2339_v1 = vld [vmem:[%s2319_s29 + $0x8] sm:$0xff]  ;;  %v2342_v2 = vld [vmem:[%s2319_s29 + $0x18] sm:$0xff]  ;;  %p1438_p10 = scmp.eq.s32.totalorder %s2101_s18, 0 }
  0x77   : > { %515 = vmatprep.mubr.bf16.mxu0 %v2118_v0  ;;  %708 = vmatprep.mubr.bf16.mxu1 %v2118_v0  ;;  %v2345_v3 = vld [vmem:[%s2319_s29] sm:$0xff]  ;;  %v324_v4 = vunpack.c.l.s8.bf16 %v2339_v1  ;;  %v328_v5 = vunpack.c.h.s8.bf16 %v2339_v1  ;;  %v326_v6 = vunpack.c.l.s8.bf16 %v2342_v2  ;;  %v330_v7 = vunpack.c.h.s8.bf16 %v2342_v2  ;;  %v2352_v8 = vld [vmem:[%s2319_s29 + $0x10] sm:$0xff]  ;;  %v2357_v11 = vld [vmem:[%s2319_s29 + $0x28] sm:$0xff] }
  0x78   : > { %v323_v9 = vunpack.c.l.s8.bf16 %v2345_v3  ;;  %v325_v10 = vunpack.c.l.s8.bf16 %v2352_v8  ;;  %v2360_v12 = vld [vmem:[%s2319_s29 + $0x38] sm:$0xff]  ;;  %v327_v13 = vunpack.c.h.s8.bf16 %v2345_v3  ;;  %v329_v14 = vunpack.c.h.s8.bf16 %v2352_v8  ;;  %v2373_v15 = vld [vmem:[%s2319_s29 + $0x20] sm:$0xff]  ;;  %v2382_v18 = vld [vmem:[%s2319_s29 + $0x30] sm:$0xff] }
  0x79   : > { %483 = vmatprep.subr.bf16.mxu0 %v324_v4  ;;  %676 = vmatprep.subr.bf16.mxu1 %v326_v6  ;;  %v332_v16 = vunpack.c.l.s8.bf16 %v2357_v11  ;;  %v334_v17 = vunpack.c.l.s8.bf16 %v2360_v12  ;;  %v331_v19 = vunpack.c.l.s8.bf16 %v2373_v15  ;;  %v333_v20 = vunpack.c.l.s8.bf16 %v2382_v18  ;;  %v2397_v23 = vld [vmem:[%s2319_s29 + $0x48] sm:$0xff]  ;;  %v2400_v24 = vld [vmem:[%s2319_s29 + $0x58] sm:$0xff]  ;;  %v2409_v27 = vld [vmem:[%s2319_s29 + $0x40] sm:$0xff] }
  0x7a   : > { %484 = vmatpush1.bf16.msra.mxu0 %v323_v9  ;;  %677 = vmatpush1.bf16.msra.mxu1 %v325_v10  ;;  %v336_v21 = vunpack.c.h.s8.bf16 %v2357_v11  ;;  %v338_v22 = vunpack.c.h.s8.bf16 %v2360_v12  ;;  %v335_v25 = vunpack.c.h.s8.bf16 %v2373_v15  ;;  %v337_v26 = vunpack.c.h.s8.bf16 %v2382_v18  ;;  %v2418_v30 = vld [vmem:[%s2319_s29 + $0x50] sm:$0xff]  ;;  %v2433_v35 = vld [vmem:[%s2319_s29 + $0x68] sm:$0xff]  ;;  %v2436_v36 = vld [vmem:[%s2319_s29 + $0x78] sm:$0xff] }
  0x7b   : > { %485 = vmatprep.subr.bf16.mxu0 %v328_v5  ;;  %678 = vmatprep.subr.bf16.mxu1 %v330_v7  ;;  %v340_v28 = vunpack.c.l.s8.bf16 %v2397_v23  ;;  %v342_v29 = vunpack.c.l.s8.bf16 %v2400_v24  ;;  %v339_v31 = vunpack.c.l.s8.bf16 %v2409_v27  ;;  %v341_v32 = vunpack.c.l.s8.bf16 %v2418_v30  ;;  %v2451_v41 = vld [vmem:[%s2319_s29 + $0x60] sm:$0xff]  ;;  %v2454_v42 = vld [vmem:[%s2319_s29 + $0x70] sm:$0xff]  ;;  %v1888_v50 = vld [vmem:[#allocation5 + $0x8] sm:$0xff]  }
  0x7c   : > { %v344_v33 = vunpack.c.h.s8.bf16 %v2397_v23  ;;  %v346_v34 = vunpack.c.h.s8.bf16 %v2400_v24  ;;  %v343_v37 = vunpack.c.h.s8.bf16 %v2409_v27  ;;  %v345_v38 = vunpack.c.h.s8.bf16 %v2418_v30  ;;  %v1887_v49 = vld [vmem:[#allocation5] sm:$0xff]   ;;  %v1889_v51 = vld [vmem:[#allocation5 + $0x10] sm:$0xff]   ;;  %v1890_v52 = vld [vmem:[#allocation5 + $0x18] sm:$0xff]  }
  0x7d   : > { %v348_v39 = vunpack.c.l.s8.bf16 %v2433_v35  ;;  %v350_v40 = vunpack.c.l.s8.bf16 %v2436_v36  ;;  %v347_v43 = vunpack.c.l.s8.bf16 %v2451_v41  ;;  %v2898_v44 = vunpack.c.l.s8.bf16 %v2454_v42  ;;  %v1891_v53 = vld [vmem:[#allocation5 + $0x20] sm:$0xff]   ;;  %v1892_v54 = vld [vmem:[#allocation5 + $0x28] sm:$0xff]   ;;  %v1893_v55 = vld [vmem:[#allocation5 + $0x30] sm:$0xff]  }
  0x7e   : > { %486 = vmatpush1.bf16.msra.mxu0 %v327_v13  ;;  %679 = vmatpush1.bf16.msra.mxu1 %v329_v14  ;;  %v2897_v45 = vunpack.c.h.s8.bf16 %v2433_v35  ;;  %v2896_v46 = vunpack.c.h.s8.bf16 %v2436_v36  ;;  %v2895_v47 = vunpack.c.h.s8.bf16 %v2451_v41  ;;  %v2894_v48 = vunpack.c.h.s8.bf16 %v2454_v42  ;;  %v1894_v56 = vld [vmem:[#allocation5 + $0x38] sm:$0xff]   ;;  %v1895_v57 = vld [vmem:[#allocation5 + $0x40] sm:$0xff]   ;;  %v1896_v58 = vld [vmem:[#allocation5 + $0x48] sm:$0xff]  }
  0x7f   : > { %487 = vmatprep.subr.bf16.mxu0 %v332_v16  ;;  %680 = vmatprep.subr.bf16.mxu1 %v334_v17  ;;  %v1897_v59 = vld [vmem:[#allocation5 + $0x50] sm:$0xff]   ;;  %v1898_v60 = vld [vmem:[#allocation5 + $0x58] sm:$0xff]   ;;  %v1899_v61 = vld [vmem:[#allocation5 + $0x60] sm:$0xff]   ;;  %v2912_v1 = vunpack.c.l.s8.bf16 %v2454_v42  ;;  %v2913_v2 = vunpack.c.h.s8.bf16 %v2433_v35  ;;  %v2914_v3 = vunpack.c.h.s8.bf16 %v2436_v36 }
  0x80   : > { %v1900_v62 = vld [vmem:[#allocation5 + $0x68] sm:$0xff]   ;;  %v1901_v63 = vld [vmem:[#allocation5 + $0x70] sm:$0xff]  }
  0x82   : > { %488 = vmatpush1.bf16.msra.mxu0 %v331_v19  ;;  %681 = vmatpush1.bf16.msra.mxu1 %v333_v20 }
  0x83   : > { %489 = vmatprep.subr.bf16.mxu0 %v336_v21  ;;  %682 = vmatprep.subr.bf16.mxu1 %v338_v22 }
  0x86   : > { %490 = vmatpush1.bf16.msra.mxu0 %v335_v25  ;;  %683 = vmatpush1.bf16.msra.mxu1 %v337_v26 }
  0x87   : > { %491 = vmatprep.subr.bf16.mxu0 %v340_v28  ;;  %684 = vmatprep.subr.bf16.mxu1 %v342_v29 }
  0x8a   : > { %492 = vmatpush1.bf16.msra.mxu0 %v339_v31  ;;  %685 = vmatpush1.bf16.msra.mxu1 %v341_v32 }
  0x8b   : > { %493 = vmatprep.subr.bf16.mxu0 %v344_v33  ;;  %686 = vmatprep.subr.bf16.mxu1 %v346_v34 }
  0x8e   : > { %494 = vmatpush1.bf16.msra.mxu0 %v343_v37  ;;  %687 = vmatpush1.bf16.msra.mxu1 %v345_v38 }
  0x8f   : > { %495 = vmatprep.subr.bf16.mxu0 %v348_v39  ;;  %688 = vmatprep.subr.bf16.mxu1 %v350_v40 }
  0x92   : > { %496 = vmatpush1.bf16.msra.mxu0 %v347_v43  ;;  %689 = vmatpush1.bf16.msra.mxu1 %v2898_v44 }
  0x93   : > { %497 = vmatprep.subr.bf16.mxu0 %v2897_v45  ;;  %690 = vmatprep.subr.bf16.mxu1 %v2896_v46 }
  0x96   : > { %498 = vmatpush1.bf16.msra.mxu0 %v2895_v47  ;;  %691 = vmatpush1.bf16.msra.mxu1 %v2894_v48 }
  0x99   : > { %516 = vmatmul.mubr.bf16.vlgmr.msra.gmra.mrb[0].mxu0 %v1887_v49  ;;  %709 = vmatmul.mubr.bf16.vlgmr.msra.gmra.mrb[0].mxu1 %v1887_v49  ;;  %v1902_v49 = vld [vmem:[#allocation5 + $0x78] sm:$0xff]  }
  0x9a   : > { %525 = vmatprep.mubr.bf16.mxu0 %v2118_v0  ;;  %718 = vmatprep.mubr.bf16.mxu1 %v2118_v0 }
  0xa1   : > { %526 = vmatmul.mubr.bf16.gmra.mrb[4].mxu0 %v1888_v50  ;;  %719 = vmatmul.mubr.bf16.gmra.mrb[4].mxu1 %v1888_v50  ;;  %v871_v50 = vlaneseq }
  0xa2   : > { %535 = vmatprep.mubr.bf16.mxu0 %v2118_v0  ;;  %728 = vmatprep.mubr.bf16.mxu1 %v2118_v0 }
  0xa9   : > { %536 = vmatmul.mubr.bf16.gmra.mrb[8].mxu0 %v1889_v51  ;;  %729 = vmatmul.mubr.bf16.gmra.mrb[8].mxu1 %v1889_v51  ;;  %v872_v51 = vshrl.u32 %v871_v50, 7 }
  0xaa   : > { %545 = vmatprep.mubr.bf16.mxu0 %v2118_v0  ;;  %738 = vmatprep.mubr.bf16.mxu1 %v2118_v0 }
  0xb1   : > { %546 = vmatmul.mubr.bf16.gmra.mrb[12].mxu0 %v1890_v52  ;;  %739 = vmatmul.mubr.bf16.gmra.mrb[12].mxu1 %v1890_v52  ;;  %v873_v52 = vsub.s32 0, %v872_v51 }
  0xb2   : > { %555 = vmatprep.mubr.bf16.mxu0 %v2118_v0  ;;  %748 = vmatprep.mubr.bf16.mxu1 %v2118_v0 }
  0xb9   : > { %556 = vmatmul.mubr.bf16.gmra.mrb[16].mxu0 %v1891_v53  ;;  %749 = vmatmul.mubr.bf16.gmra.mrb[16].mxu1 %v1891_v53  ;;  %v881_v53 = vsub.s32 2, %v872_v51 }
  0xba   : > { %565 = vmatprep.mubr.bf16.mxu0 %v2118_v0  ;;  %758 = vmatprep.mubr.bf16.mxu1 %v2118_v0 }
  0xc1   : > { %566 = vmatmul.mubr.bf16.gmra.mrb[20].mxu0 %v1892_v54  ;;  %759 = vmatmul.mubr.bf16.gmra.mrb[20].mxu1 %v1892_v54  ;;  %v869_v54 = vld [vmem:[%s275_s9] sm:$0xf] }
  0xc2   : > { %575 = vmatprep.mubr.bf16.mxu0 %v2118_v0  ;;  %768 = vmatprep.mubr.bf16.mxu1 %v2118_v0 }
  0xc9   : > { %576 = vmatmul.mubr.bf16.gmra.mrb[24].mxu0 %v1893_v55  ;;  %769 = vmatmul.mubr.bf16.gmra.mrb[24].mxu1 %v1893_v55  ;;  %v877_v55 = vsub.s32 1, %v872_v51 }
  0xca   : > { %585 = vmatprep.mubr.bf16.mxu0 %v2118_v0  ;;  %778 = vmatprep.mubr.bf16.mxu1 %v2118_v0 }
  0xd1   : > { %586 = vmatmul.mubr.bf16.gmra.mrb[28].mxu0 %v1894_v56  ;;  %779 = vmatmul.mubr.bf16.gmra.mrb[28].mxu1 %v1894_v56  ;;  %v885_v56 = vsub.s32 3, %v872_v51 }
  0xd2   : > { %595 = vmatprep.mubr.bf16.mxu0 %v2118_v0  ;;  %788 = vmatprep.mubr.bf16.mxu1 %v2118_v0 }
  0xd9   : > { %596 = vmatmul.mubr.bf16.gmra.mrb[32].mxu0 %v1895_v57  ;;  %789 = vmatmul.mubr.bf16.gmra.mrb[32].mxu1 %v1895_v57  ;;  %v2518_v57 = vrot.slane %v869_v54, %v873_v52 }
  0xda   : > { %605 = vmatprep.mubr.bf16.mxu0 %v2118_v0  ;;  %798 = vmatprep.mubr.bf16.mxu1 %v2118_v0 }
  0xe1   : > { %606 = vmatmul.mubr.bf16.gmra.mrb[36].mxu0 %v1896_v58  ;;  %799 = vmatmul.mubr.bf16.gmra.mrb[36].mxu1 %v1896_v58  ;;  %v2522_v58 = vrot.slane %v869_v54, %v877_v55 }
  0xe2   : > { %615 = vmatprep.mubr.bf16.mxu0 %v2118_v0  ;;  %808 = vmatprep.mubr.bf16.mxu1 %v2118_v0 }
  0xe9   : > { %616 = vmatmul.mubr.bf16.gmra.mrb[40].mxu0 %v1897_v59  ;;  %809 = vmatmul.mubr.bf16.gmra.mrb[40].mxu1 %v1897_v59  ;;  %v2524_v59 = vrot.slane %v869_v54, %v885_v56 }
  0xea   : > { %625 = vmatprep.mubr.bf16.mxu0 %v2118_v0  ;;  %818 = vmatprep.mubr.bf16.mxu1 %v2118_v0 }
  0xf1   : > { %626 = vmatmul.mubr.bf16.gmra.mrb[44].mxu0 %v1898_v60  ;;  %819 = vmatmul.mubr.bf16.gmra.mrb[44].mxu1 %v1898_v60 }
  0xf2   : > { %635 = vmatprep.mubr.bf16.mxu0 %v2118_v0  ;;  %828 = vmatprep.mubr.bf16.mxu1 %v2118_v0 }
  0xf9   : > { %636 = vmatmul.mubr.bf16.gmra.mrb[48].mxu0 %v1899_v61  ;;  %829 = vmatmul.mubr.bf16.gmra.mrb[48].mxu1 %v1899_v61 }
  0xfa   : > { %645 = vmatprep.mubr.bf16.mxu0 %v2118_v0  ;;  %838 = vmatprep.mubr.bf16.mxu1 %v2118_v0 }
 0x101   : > { %646 = vmatmul.mubr.bf16.gmra.mrb[52].mxu0 %v1900_v62  ;;  %839 = vmatmul.mubr.bf16.gmra.mrb[52].mxu1 %v1900_v62 }
 0x102   : > { %655 = vmatprep.mubr.bf16.mxu0 %v2118_v0  ;;  %848 = vmatprep.mubr.bf16.mxu1 %v2118_v0 }
 0x109   : > { %656 = vmatmul.mubr.bf16.gmra.mrb[56].mxu0 %v1901_v63  ;;  %849 = vmatmul.mubr.bf16.gmra.mrb[56].mxu1 %v1901_v63 }
 0x10a   : > { %665 = vmatprep.mubr.bf16.mxu0 %v2118_v0  ;;  %858 = vmatprep.mubr.bf16.mxu1 %v2118_v0  ;;  %v2520_v0 = vrot.slane %v869_v54, %v881_v53 }
 0x111   : > { %666 = vmatmul.mubr.bf16.gmra.mrb[60].mxu0 %v1902_v49  ;;  %859 = vmatmul.mubr.bf16.gmra.mrb[60].mxu1 %v1902_v49 }
 0x112   : > { %1243 = vmatprep.mubr.bf16.mxu1 %v324_v4  ;;  %1356 = vmatprep.mubr.bf16.mxu0 %v326_v6 }
 0x16c   : > { %v517_v4 = vpop.f32.mrb[0].mxu0  ;;  %v710_v60 = vpop.f32.mrb[0].mxu1 }
 0x16d   : > { %v891_v6 = vmul.f32 %v2518_v57, %v517_v4  ;;  %v893_v61 = vmul.f32 %v2520_v0, %v710_v60  ;;  %v519_v62 = vpop.f32.mrb[1].mxu0  ;;  %v712_v63 = vpop.f32.mrb[1].mxu1 }
 0x16e   : > { %v892_v49 = vmul.f32 %v2522_v58, %v519_v62  ;;  %v894_v50 = vmul.f32 %v2524_v59, %v712_v63  ;;  %v521_v51 = vpop.f32.mrb[2].mxu0  ;;  %v714_v52 = vpop.f32.mrb[2].mxu1 }
 0x16f   : > { %1019 = vst [vmem:[#allocation9] sm:$0xff] %v891_v6  ;;  %1021 = vst [vmem:[#allocation9 + $0x10] sm:$0xff] %v893_v61  ;;  %v895_v53 = vmul.f32 %v2518_v57, %v521_v51  ;;  %v897_v54 = vmul.f32 %v2520_v0, %v714_v52  ;;  %v523_v55 = vpop.f32.mrb[3].mxu0  ;;  %v716_v56 = vpop.f32.mrb[3].mxu1 }
 0x170   : > { %1020 = vst [vmem:[#allocation9 + $0x8] sm:$0xff] %v892_v49  ;;  %1022 = vst [vmem:[#allocation9 + $0x18] sm:$0xff] %v894_v50  ;;  %v896_v4 = vmul.f32 %v2522_v58, %v523_v55  ;;  %v898_v60 = vmul.f32 %v2524_v59, %v716_v56 }
 0x171   : > { %1023 = vst [vmem:[#allocation9 + $0x20] sm:$0xff] %v895_v53  ;;  %v1147_v62 = vpack.c.bf16 %v895_v53, %v891_v6  ;;  %1025 = vst [vmem:[#allocation9 + $0x30] sm:$0xff] %v897_v54  ;;  %v1149_v63 = vpack.c.bf16 %v897_v54, %v893_v61 }
 0x172   : > { %1024 = vst [vmem:[#allocation9 + $0x28] sm:$0xff] %v896_v4  ;;  %v1148_v48 = vpack.c.bf16 %v896_v4, %v892_v49  ;;  %1026 = vst [vmem:[#allocation9 + $0x38] sm:$0xff] %v898_v60  ;;  %v1150_v47 = vpack.c.bf16 %v898_v60, %v894_v50 }
 0x174   : > { %v527_v46 = vpop.f32.mrb[4].mxu0  ;;  %v720_v51 = vpop.f32.mrb[4].mxu1  ;;  %1211 = vmatprep.subr.bf16.mxu1 %v1148_v48  ;;  %1324 = vmatprep.subr.bf16.mxu0 %v1150_v47 }
 0x175   : > { %v899_v52 = vmul.f32 %v2518_v57, %v527_v46  ;;  %v901_v45 = vmul.f32 %v2520_v0, %v720_v51  ;;  %v529_v44 = vpop.f32.mrb[5].mxu0  ;;  %v722_v55 = vpop.f32.mrb[5].mxu1  ;;  %1212 = vmatpush1.bf16.xpose.msra.mxu1 %v1147_v62  ;;  %1325 = vmatpush1.bf16.xpose.msra.mxu0 %v1149_v63 }
 0x176   : > { %v900_v6 = vmul.f32 %v2522_v58, %v529_v44  ;;  %v902_v61 = vmul.f32 %v2524_v59, %v722_v55  ;;  %v531_v53 = vpop.f32.mrb[6].mxu0  ;;  %v724_v49 = vpop.f32.mrb[6].mxu1 }
 0x177   : > { %1027 = vst [vmem:[#allocation9 + $0x40] sm:$0xff] %v899_v52  ;;  %1029 = vst [vmem:[#allocation9 + $0x50] sm:$0xff] %v901_v45  ;;  %v903_v50 = vmul.f32 %v2518_v57, %v531_v53  ;;  %v905_v47 = vmul.f32 %v2520_v0, %v724_v49  ;;  %v533_v48 = vpop.f32.mrb[7].mxu0  ;;  %v726_v46 = vpop.f32.mrb[7].mxu1 }
 0x178   : > { %1028 = vst [vmem:[#allocation9 + $0x48] sm:$0xff] %v900_v6  ;;  %1030 = vst [vmem:[#allocation9 + $0x58] sm:$0xff] %v902_v61  ;;  %v904_v54 = vmul.f32 %v2522_v58, %v533_v48  ;;  %v906_v56 = vmul.f32 %v2524_v59, %v726_v46 }
 0x179   : > { %1031 = vst [vmem:[#allocation9 + $0x60] sm:$0xff] %v903_v50  ;;  %v1151_v44 = vpack.c.bf16 %v903_v50, %v899_v52  ;;  %1033 = vst [vmem:[#allocation9 + $0x70] sm:$0xff] %v905_v47  ;;  %v1153_v4 = vpack.c.bf16 %v905_v47, %v901_v45 }
 0x17a   : > { %1032 = vst [vmem:[#allocation9 + $0x68] sm:$0xff] %v904_v54  ;;  %v1152_v60 = vpack.c.bf16 %v904_v54, %v900_v6  ;;  %1034 = vst [vmem:[#allocation9 + $0x78] sm:$0xff] %v906_v56  ;;  %v1154_v62 = vpack.c.bf16 %v906_v56, %v902_v61 }
 0x17c   : > { %v537_v63 = vpop.f32.mrb[8].mxu0  ;;  %v730_v51 = vpop.f32.mrb[8].mxu1  ;;  %1213 = vmatprep.subr.bf16.mxu1 %v1152_v60  ;;  %1326 = vmatprep.subr.bf16.mxu0 %v1154_v62 }
 0x17d   : > { %v907_v55 = vmul.f32 %v2518_v57, %v537_v63  ;;  %v909_v53 = vmul.f32 %v2520_v0, %v730_v51  ;;  %v539_v49 = vpop.f32.mrb[9].mxu0  ;;  %v732_v48 = vpop.f32.mrb[9].mxu1  ;;  %1214 = vmatpush1.bf16.xpose.msra.mxu1 %v1151_v44  ;;  %1327 = vmatpush1.bf16.xpose.msra.mxu0 %v1153_v4 }
 0x17e   : > { %v908_v52 = vmul.f32 %v2522_v58, %v539_v49  ;;  %v910_v45 = vmul.f32 %v2524_v59, %v732_v48  ;;  %v541_v50 = vpop.f32.mrb[10].mxu0  ;;  %v734_v6 = vpop.f32.mrb[10].mxu1 }
 0x17f   : > { %1035 = vst [vmem:[#allocation9 + $0x80] sm:$0xff] %v907_v55  ;;  %1037 = vst [vmem:[#allocation9 + $0x90] sm:$0xff] %v909_v53  ;;  %v911_v61 = vmul.f32 %v2518_v57, %v541_v50  ;;  %v913_v47 = vmul.f32 %v2520_v0, %v734_v6  ;;  %v543_v46 = vpop.f32.mrb[11].mxu0  ;;  %v736_v54 = vpop.f32.mrb[11].mxu1 }
 0x180   : > { %1036 = vst [vmem:[#allocation9 + $0x88] sm:$0xff] %v908_v52  ;;  %1038 = vst [vmem:[#allocation9 + $0x98] sm:$0xff] %v910_v45  ;;  %v912_v56 = vmul.f32 %v2522_v58, %v543_v46  ;;  %v914_v44 = vmul.f32 %v2524_v59, %v736_v54 }
 0x181   : > { %1039 = vst [vmem:[#allocation9 + $0xa0] sm:$0xff] %v911_v61  ;;  %v1155_v4 = vpack.c.bf16 %v911_v61, %v907_v55  ;;  %1041 = vst [vmem:[#allocation9 + $0xb0] sm:$0xff] %v913_v47  ;;  %v1157_v60 = vpack.c.bf16 %v913_v47, %v909_v53 }
 0x182   : > { %1040 = vst [vmem:[#allocation9 + $0xa8] sm:$0xff] %v912_v56  ;;  %v1156_v62 = vpack.c.bf16 %v912_v56, %v908_v52  ;;  %1042 = vst [vmem:[#allocation9 + $0xb8] sm:$0xff] %v914_v44  ;;  %v1158_v63 = vpack.c.bf16 %v914_v44, %v910_v45 }
 0x184   : > { %v547_v51 = vpop.f32.mrb[12].mxu0  ;;  %v740_v49 = vpop.f32.mrb[12].mxu1  ;;  %1215 = vmatprep.subr.bf16.mxu1 %v1156_v62  ;;  %1328 = vmatprep.subr.bf16.mxu0 %v1158_v63 }
 0x185   : > { %v915_v48 = vmul.f32 %v2518_v57, %v547_v51  ;;  %v917_v50 = vmul.f32 %v2520_v0, %v740_v49  ;;  %v549_v6 = vpop.f32.mrb[13].mxu0  ;;  %v742_v46 = vpop.f32.mrb[13].mxu1  ;;  %1216 = vmatpush1.bf16.xpose.msra.mxu1 %v1155_v4  ;;  %1329 = vmatpush1.bf16.xpose.msra.mxu0 %v1157_v60 }
 0x186   : > { %v916_v55 = vmul.f32 %v2522_v58, %v549_v6  ;;  %v918_v53 = vmul.f32 %v2524_v59, %v742_v46  ;;  %v551_v61 = vpop.f32.mrb[14].mxu0  ;;  %v744_v52 = vpop.f32.mrb[14].mxu1 }
 0x187   : > { %1043 = vst [vmem:[#allocation9 + $0xc0] sm:$0xff] %v915_v48  ;;  %1045 = vst [vmem:[#allocation9 + $0xd0] sm:$0xff] %v917_v50  ;;  %v919_v45 = vmul.f32 %v2518_v57, %v551_v61  ;;  %v921_v47 = vmul.f32 %v2520_v0, %v744_v52  ;;  %v553_v54 = vpop.f32.mrb[15].mxu0  ;;  %v746_v56 = vpop.f32.mrb[15].mxu1 }
 0x188   : > { %1044 = vst [vmem:[#allocation9 + $0xc8] sm:$0xff] %v916_v55  ;;  %1046 = vst [vmem:[#allocation9 + $0xd8] sm:$0xff] %v918_v53  ;;  %v920_v44 = vmul.f32 %v2522_v58, %v553_v54  ;;  %v922_v4 = vmul.f32 %v2524_v59, %v746_v56 }
 0x189   : > { %1047 = vst [vmem:[#allocation9 + $0xe0] sm:$0xff] %v919_v45  ;;  %v1159_v60 = vpack.c.bf16 %v919_v45, %v915_v48  ;;  %1049 = vst [vmem:[#allocation9 + $0xf0] sm:$0xff] %v921_v47  ;;  %v1161_v62 = vpack.c.bf16 %v921_v47, %v917_v50 }
 0x18a   : > { %1048 = vst [vmem:[#allocation9 + $0xe8] sm:$0xff] %v920_v44  ;;  %v1160_v63 = vpack.c.bf16 %v920_v44, %v916_v55  ;;  %1050 = vst [vmem:[#allocation9 + $0xf8] sm:$0xff] %v922_v4  ;;  %v1162_v51 = vpack.c.bf16 %v922_v4, %v918_v53 }
 0x18c   : > { %v557_v49 = vpop.f32.mrb[16].mxu0  ;;  %v750_v6 = vpop.f32.mrb[16].mxu1  ;;  %1217 = vmatprep.subr.bf16.mxu1 %v1160_v63  ;;  %1330 = vmatprep.subr.bf16.mxu0 %v1162_v51 }
 0x18d   : > { %v923_v46 = vmul.f32 %v2518_v57, %v557_v49  ;;  %v925_v61 = vmul.f32 %v2520_v0, %v750_v6  ;;  %v559_v52 = vpop.f32.mrb[17].mxu0  ;;  %v752_v54 = vpop.f32.mrb[17].mxu1  ;;  %1218 = vmatpush1.bf16.xpose.msra.mxu1 %v1159_v60  ;;  %1331 = vmatpush1.bf16.xpose.msra.mxu0 %v1161_v62 }
 0x18e   : > { %v924_v48 = vmul.f32 %v2522_v58, %v559_v52  ;;  %v926_v50 = vmul.f32 %v2524_v59, %v752_v54  ;;  %v561_v45 = vpop.f32.mrb[18].mxu0  ;;  %v754_v55 = vpop.f32.mrb[18].mxu1 }
 0x18f   : > { %1051 = vst [vmem:[#allocation9 + $0x100] sm:$0xff] %v923_v46  ;;  %1053 = vst [vmem:[#allocation9 + $0x110] sm:$0xff] %v925_v61  ;;  %v927_v53 = vmul.f32 %v2518_v57, %v561_v45  ;;  %v929_v47 = vmul.f32 %v2520_v0, %v754_v55  ;;  %v563_v56 = vpop.f32.mrb[19].mxu0  ;;  %v756_v44 = vpop.f32.mrb[19].mxu1 }
 0x190   : > { %1052 = vst [vmem:[#allocation9 + $0x108] sm:$0xff] %v924_v48  ;;  %1054 = vst [vmem:[#allocation9 + $0x118] sm:$0xff] %v926_v50  ;;  %v928_v4 = vmul.f32 %v2522_v58, %v563_v56  ;;  %v930_v60 = vmul.f32 %v2524_v59, %v756_v44 }
 0x191   : > { %1055 = vst [vmem:[#allocation9 + $0x120] sm:$0xff] %v927_v53  ;;  %v1163_v62 = vpack.c.bf16 %v927_v53, %v923_v46  ;;  %1057 = vst [vmem:[#allocation9 + $0x130] sm:$0xff] %v929_v47  ;;  %v1165_v63 = vpack.c.bf16 %v929_v47, %v925_v61 }
 0x192   : > { %1056 = vst [vmem:[#allocation9 + $0x128] sm:$0xff] %v928_v4  ;;  %v1164_v51 = vpack.c.bf16 %v928_v4, %v924_v48  ;;  %1058 = vst [vmem:[#allocation9 + $0x138] sm:$0xff] %v930_v60  ;;  %v1166_v49 = vpack.c.bf16 %v930_v60, %v926_v50 }
 0x194   : > { %v567_v6 = vpop.f32.mrb[20].mxu0  ;;  %v760_v52 = vpop.f32.mrb[20].mxu1  ;;  %1219 = vmatprep.subr.bf16.mxu1 %v1164_v51  ;;  %1332 = vmatprep.subr.bf16.mxu0 %v1166_v49 }
 0x195   : > { %v931_v54 = vmul.f32 %v2518_v57, %v567_v6  ;;  %v933_v45 = vmul.f32 %v2520_v0, %v760_v52  ;;  %v569_v55 = vpop.f32.mrb[21].mxu0  ;;  %v762_v56 = vpop.f32.mrb[21].mxu1  ;;  %1220 = vmatpush1.bf16.xpose.msra.mxu1 %v1163_v62  ;;  %1333 = vmatpush1.bf16.xpose.msra.mxu0 %v1165_v63 }
 0x196   : > { %v932_v46 = vmul.f32 %v2522_v58, %v569_v55  ;;  %v934_v61 = vmul.f32 %v2524_v59, %v762_v56  ;;  %v571_v53 = vpop.f32.mrb[22].mxu0  ;;  %v764_v48 = vpop.f32.mrb[22].mxu1 }
 0x197   : > { %1059 = vst [vmem:[#allocation9 + $0x140] sm:$0xff] %v931_v54  ;;  %1061 = vst [vmem:[#allocation9 + $0x150] sm:$0xff] %v933_v45  ;;  %v935_v50 = vmul.f32 %v2518_v57, %v571_v53  ;;  %v937_v47 = vmul.f32 %v2520_v0, %v764_v48  ;;  %v573_v44 = vpop.f32.mrb[23].mxu0  ;;  %v766_v4 = vpop.f32.mrb[23].mxu1 }
 0x198   : > { %1060 = vst [vmem:[#allocation9 + $0x148] sm:$0xff] %v932_v46  ;;  %1062 = vst [vmem:[#allocation9 + $0x158] sm:$0xff] %v934_v61  ;;  %v936_v60 = vmul.f32 %v2522_v58, %v573_v44  ;;  %v938_v62 = vmul.f32 %v2524_v59, %v766_v4 }
 0x199   : > { %1063 = vst [vmem:[#allocation9 + $0x160] sm:$0xff] %v935_v50  ;;  %v1167_v63 = vpack.c.bf16 %v935_v50, %v931_v54  ;;  %1065 = vst [vmem:[#allocation9 + $0x170] sm:$0xff] %v937_v47  ;;  %v1169_v51 = vpack.c.bf16 %v937_v47, %v933_v45 }
 0x19a   : > { %1064 = vst [vmem:[#allocation9 + $0x168] sm:$0xff] %v936_v60  ;;  %v1168_v49 = vpack.c.bf16 %v936_v60, %v932_v46  ;;  %1066 = vst [vmem:[#allocation9 + $0x178] sm:$0xff] %v938_v62  ;;  %v1170_v6 = vpack.c.bf16 %v938_v62, %v934_v61 }
 0x19c   : > { %v577_v52 = vpop.f32.mrb[24].mxu0  ;;  %v770_v55 = vpop.f32.mrb[24].mxu1  ;;  %1221 = vmatprep.subr.bf16.mxu1 %v1168_v49  ;;  %1334 = vmatprep.subr.bf16.mxu0 %v1170_v6 }
 0x19d   : > { %v939_v56 = vmul.f32 %v2518_v57, %v577_v52  ;;  %v941_v53 = vmul.f32 %v2520_v0, %v770_v55  ;;  %v579_v48 = vpop.f32.mrb[25].mxu0  ;;  %v772_v44 = vpop.f32.mrb[25].mxu1  ;;  %1222 = vmatpush1.bf16.xpose.msra.mxu1 %v1167_v63  ;;  %1335 = vmatpush1.bf16.xpose.msra.mxu0 %v1169_v51 }
 0x19e   : > { %v940_v54 = vmul.f32 %v2522_v58, %v579_v48  ;;  %v942_v45 = vmul.f32 %v2524_v59, %v772_v44  ;;  %v581_v50 = vpop.f32.mrb[26].mxu0  ;;  %v774_v46 = vpop.f32.mrb[26].mxu1 }
 0x19f   : > { %1067 = vst [vmem:[#allocation9 + $0x180] sm:$0xff] %v939_v56  ;;  %1069 = vst [vmem:[#allocation9 + $0x190] sm:$0xff] %v941_v53  ;;  %v943_v61 = vmul.f32 %v2518_v57, %v581_v50  ;;  %v945_v47 = vmul.f32 %v2520_v0, %v774_v46  ;;  %v583_v4 = vpop.f32.mrb[27].mxu0  ;;  %v776_v60 = vpop.f32.mrb[27].mxu1 }
 0x1a0   : > { %1068 = vst [vmem:[#allocation9 + $0x188] sm:$0xff] %v940_v54  ;;  %1070 = vst [vmem:[#allocation9 + $0x198] sm:$0xff] %v942_v45  ;;  %v944_v62 = vmul.f32 %v2522_v58, %v583_v4  ;;  %v946_v63 = vmul.f32 %v2524_v59, %v776_v60 }
 0x1a1   : > { %1071 = vst [vmem:[#allocation9 + $0x1a0] sm:$0xff] %v943_v61  ;;  %v1171_v51 = vpack.c.bf16 %v943_v61, %v939_v56  ;;  %1073 = vst [vmem:[#allocation9 + $0x1b0] sm:$0xff] %v945_v47  ;;  %v1173_v49 = vpack.c.bf16 %v945_v47, %v941_v53 }
 0x1a2   : > { %1072 = vst [vmem:[#allocation9 + $0x1a8] sm:$0xff] %v944_v62  ;;  %v1172_v6 = vpack.c.bf16 %v944_v62, %v940_v54  ;;  %1074 = vst [vmem:[#allocation9 + $0x1b8] sm:$0xff] %v946_v63  ;;  %v1174_v52 = vpack.c.bf16 %v946_v63, %v942_v45 }
 0x1a4   : > { %v587_v55 = vpop.f32.mrb[28].mxu0  ;;  %v780_v48 = vpop.f32.mrb[28].mxu1  ;;  %1223 = vmatprep.subr.bf16.mxu1 %v1172_v6  ;;  %1336 = vmatprep.subr.bf16.mxu0 %v1174_v52 }
 0x1a5   : > { %v947_v44 = vmul.f32 %v2518_v57, %v587_v55  ;;  %v949_v50 = vmul.f32 %v2520_v0, %v780_v48  ;;  %v589_v46 = vpop.f32.mrb[29].mxu0  ;;  %v782_v4 = vpop.f32.mrb[29].mxu1  ;;  %1224 = vmatpush1.bf16.xpose.msra.mxu1 %v1171_v51  ;;  %1337 = vmatpush1.bf16.xpose.msra.mxu0 %v1173_v49 }
 0x1a6   : > { %v948_v56 = vmul.f32 %v2522_v58, %v589_v46  ;;  %v950_v53 = vmul.f32 %v2524_v59, %v782_v4  ;;  %v591_v61 = vpop.f32.mrb[30].mxu0  ;;  %v784_v54 = vpop.f32.mrb[30].mxu1 }
 0x1a7   : > { %1075 = vst [vmem:[#allocation9 + $0x1c0] sm:$0xff] %v947_v44  ;;  %1077 = vst [vmem:[#allocation9 + $0x1d0] sm:$0xff] %v949_v50  ;;  %v951_v45 = vmul.f32 %v2518_v57, %v591_v61  ;;  %v953_v47 = vmul.f32 %v2520_v0, %v784_v54  ;;  %v593_v60 = vpop.f32.mrb[31].mxu0  ;;  %v786_v62 = vpop.f32.mrb[31].mxu1 }
 0x1a8   : > { %1076 = vst [vmem:[#allocation9 + $0x1c8] sm:$0xff] %v948_v56  ;;  %1078 = vst [vmem:[#allocation9 + $0x1d8] sm:$0xff] %v950_v53  ;;  %v952_v63 = vmul.f32 %v2522_v58, %v593_v60  ;;  %v954_v51 = vmul.f32 %v2524_v59, %v786_v62 }
 0x1a9   : > { %1079 = vst [vmem:[#allocation9 + $0x1e0] sm:$0xff] %v951_v45  ;;  %v1175_v49 = vpack.c.bf16 %v951_v45, %v947_v44  ;;  %1081 = vst [vmem:[#allocation9 + $0x1f0] sm:$0xff] %v953_v47  ;;  %v1177_v6 = vpack.c.bf16 %v953_v47, %v949_v50 }
 0x1aa   : > { %1080 = vst [vmem:[#allocation9 + $0x1e8] sm:$0xff] %v952_v63  ;;  %v1176_v52 = vpack.c.bf16 %v952_v63, %v948_v56  ;;  %1082 = vst [vmem:[#allocation9 + $0x1f8] sm:$0xff] %v954_v51  ;;  %v1178_v55 = vpack.c.bf16 %v954_v51, %v950_v53 }
 0x1ac   : > { %v597_v48 = vpop.f32.mrb[32].mxu0  ;;  %v790_v46 = vpop.f32.mrb[32].mxu1  ;;  %1225 = vmatprep.subr.bf16.mxu1 %v1176_v52  ;;  %1338 = vmatprep.subr.bf16.mxu0 %v1178_v55 }
 0x1ad   : > { %v955_v4 = vmul.f32 %v2518_v57, %v597_v48  ;;  %v957_v61 = vmul.f32 %v2520_v0, %v790_v46  ;;  %v599_v54 = vpop.f32.mrb[33].mxu0  ;;  %v792_v60 = vpop.f32.mrb[33].mxu1  ;;  %1226 = vmatpush1.bf16.xpose.msra.mxu1 %v1175_v49  ;;  %1339 = vmatpush1.bf16.xpose.msra.mxu0 %v1177_v6 }
 0x1ae   : > { %v956_v44 = vmul.f32 %v2522_v58, %v599_v54  ;;  %v958_v50 = vmul.f32 %v2524_v59, %v792_v60  ;;  %v601_v45 = vpop.f32.mrb[34].mxu0  ;;  %v794_v56 = vpop.f32.mrb[34].mxu1 }
 0x1af   : > { %1083 = vst [vmem:[#allocation9 + $0x200] sm:$0xff] %v955_v4  ;;  %1085 = vst [vmem:[#allocation9 + $0x210] sm:$0xff] %v957_v61  ;;  %v959_v53 = vmul.f32 %v2518_v57, %v601_v45  ;;  %v961_v47 = vmul.f32 %v2520_v0, %v794_v56  ;;  %v603_v62 = vpop.f32.mrb[35].mxu0  ;;  %v796_v63 = vpop.f32.mrb[35].mxu1 }
 0x1b0   : > { %1084 = vst [vmem:[#allocation9 + $0x208] sm:$0xff] %v956_v44  ;;  %1086 = vst [vmem:[#allocation9 + $0x218] sm:$0xff] %v958_v50  ;;  %v960_v51 = vmul.f32 %v2522_v58, %v603_v62  ;;  %v962_v49 = vmul.f32 %v2524_v59, %v796_v63 }
 0x1b1   : > { %1087 = vst [vmem:[#allocation9 + $0x220] sm:$0xff] %v959_v53  ;;  %v1179_v6 = vpack.c.bf16 %v959_v53, %v955_v4  ;;  %1089 = vst [vmem:[#allocation9 + $0x230] sm:$0xff] %v961_v47  ;;  %v1181_v52 = vpack.c.bf16 %v961_v47, %v957_v61 }
 0x1b2   : > { %1088 = vst [vmem:[#allocation9 + $0x228] sm:$0xff] %v960_v51  ;;  %v1180_v55 = vpack.c.bf16 %v960_v51, %v956_v44  ;;  %1090 = vst [vmem:[#allocation9 + $0x238] sm:$0xff] %v962_v49  ;;  %v1182_v48 = vpack.c.bf16 %v962_v49, %v958_v50 }
 0x1b4   : > { %v607_v46 = vpop.f32.mrb[36].mxu0  ;;  %v800_v54 = vpop.f32.mrb[36].mxu1  ;;  %1227 = vmatprep.subr.bf16.mxu1 %v1180_v55  ;;  %1340 = vmatprep.subr.bf16.mxu0 %v1182_v48 }
 0x1b5   : > { %v963_v60 = vmul.f32 %v2518_v57, %v607_v46  ;;  %v965_v45 = vmul.f32 %v2520_v0, %v800_v54  ;;  %v609_v56 = vpop.f32.mrb[37].mxu0  ;;  %v802_v62 = vpop.f32.mrb[37].mxu1  ;;  %1228 = vmatpush1.bf16.xpose.msra.mxu1 %v1179_v6  ;;  %1341 = vmatpush1.bf16.xpose.msra.mxu0 %v1181_v52 }
 0x1b6   : > { %v964_v4 = vmul.f32 %v2522_v58, %v609_v56  ;;  %v966_v61 = vmul.f32 %v2524_v59, %v802_v62  ;;  %v611_v53 = vpop.f32.mrb[38].mxu0  ;;  %v804_v44 = vpop.f32.mrb[38].mxu1 }
 0x1b7   : > { %1091 = vst [vmem:[#allocation9 + $0x240] sm:$0xff] %v963_v60  ;;  %1093 = vst [vmem:[#allocation9 + $0x250] sm:$0xff] %v965_v45  ;;  %v967_v50 = vmul.f32 %v2518_v57, %v611_v53  ;;  %v969_v47 = vmul.f32 %v2520_v0, %v804_v44  ;;  %v613_v63 = vpop.f32.mrb[39].mxu0  ;;  %v806_v51 = vpop.f32.mrb[39].mxu1 }
 0x1b8   : > { %1092 = vst [vmem:[#allocation9 + $0x248] sm:$0xff] %v964_v4  ;;  %1094 = vst [vmem:[#allocation9 + $0x258] sm:$0xff] %v966_v61  ;;  %v968_v49 = vmul.f32 %v2522_v58, %v613_v63  ;;  %v970_v6 = vmul.f32 %v2524_v59, %v806_v51 }
 0x1b9   : > { %1095 = vst [vmem:[#allocation9 + $0x260] sm:$0xff] %v967_v50  ;;  %v1183_v52 = vpack.c.bf16 %v967_v50, %v963_v60  ;;  %1097 = vst [vmem:[#allocation9 + $0x270] sm:$0xff] %v969_v47  ;;  %v1185_v55 = vpack.c.bf16 %v969_v47, %v965_v45 }
 0x1ba   : > { %1096 = vst [vmem:[#allocation9 + $0x268] sm:$0xff] %v968_v49  ;;  %v1184_v48 = vpack.c.bf16 %v968_v49, %v964_v4  ;;  %1098 = vst [vmem:[#allocation9 + $0x278] sm:$0xff] %v970_v6  ;;  %v1186_v46 = vpack.c.bf16 %v970_v6, %v966_v61 }
 0x1bc   : > { %v617_v54 = vpop.f32.mrb[40].mxu0  ;;  %v810_v56 = vpop.f32.mrb[40].mxu1  ;;  %1229 = vmatprep.subr.bf16.mxu1 %v1184_v48  ;;  %1342 = vmatprep.subr.bf16.mxu0 %v1186_v46 }
 0x1bd   : > { %v971_v62 = vmul.f32 %v2518_v57, %v617_v54  ;;  %v973_v53 = vmul.f32 %v2520_v0, %v810_v56  ;;  %v619_v44 = vpop.f32.mrb[41].mxu0  ;;  %v812_v63 = vpop.f32.mrb[41].mxu1  ;;  %1230 = vmatpush1.bf16.xpose.msra.mxu1 %v1183_v52  ;;  %1343 = vmatpush1.bf16.xpose.msra.mxu0 %v1185_v55 }
 0x1be   : > { %v972_v60 = vmul.f32 %v2522_v58, %v619_v44  ;;  %v974_v45 = vmul.f32 %v2524_v59, %v812_v63  ;;  %v621_v50 = vpop.f32.mrb[42].mxu0  ;;  %v814_v4 = vpop.f32.mrb[42].mxu1 }
 0x1bf   : > { %1099 = vst [vmem:[#allocation9 + $0x280] sm:$0xff] %v971_v62  ;;  %1101 = vst [vmem:[#allocation9 + $0x290] sm:$0xff] %v973_v53  ;;  %v975_v61 = vmul.f32 %v2518_v57, %v621_v50  ;;  %v977_v47 = vmul.f32 %v2520_v0, %v814_v4  ;;  %v623_v51 = vpop.f32.mrb[43].mxu0  ;;  %v816_v49 = vpop.f32.mrb[43].mxu1 }
 0x1c0   : > { %1100 = vst [vmem:[#allocation9 + $0x288] sm:$0xff] %v972_v60  ;;  %1102 = vst [vmem:[#allocation9 + $0x298] sm:$0xff] %v974_v45  ;;  %v976_v6 = vmul.f32 %v2522_v58, %v623_v51  ;;  %v978_v52 = vmul.f32 %v2524_v59, %v816_v49 }
 0x1c1   : > { %1103 = vst [vmem:[#allocation9 + $0x2a0] sm:$0xff] %v975_v61  ;;  %v1187_v55 = vpack.c.bf16 %v975_v61, %v971_v62  ;;  %1105 = vst [vmem:[#allocation9 + $0x2b0] sm:$0xff] %v977_v47  ;;  %v1189_v48 = vpack.c.bf16 %v977_v47, %v973_v53 }
 0x1c2   : > { %1104 = vst [vmem:[#allocation9 + $0x2a8] sm:$0xff] %v976_v6  ;;  %v1188_v46 = vpack.c.bf16 %v976_v6, %v972_v60  ;;  %1106 = vst [vmem:[#allocation9 + $0x2b8] sm:$0xff] %v978_v52  ;;  %v1190_v54 = vpack.c.bf16 %v978_v52, %v974_v45 }
 0x1c4   : > { %v627_v56 = vpop.f32.mrb[44].mxu0  ;;  %v820_v44 = vpop.f32.mrb[44].mxu1  ;;  %1231 = vmatprep.subr.bf16.mxu1 %v1188_v46  ;;  %1344 = vmatprep.subr.bf16.mxu0 %v1190_v54 }
 0x1c5   : > { %v979_v63 = vmul.f32 %v2518_v57, %v627_v56  ;;  %v981_v50 = vmul.f32 %v2520_v0, %v820_v44  ;;  %v629_v4 = vpop.f32.mrb[45].mxu0  ;;  %v822_v51 = vpop.f32.mrb[45].mxu1  ;;  %1232 = vmatpush1.bf16.xpose.msra.mxu1 %v1187_v55  ;;  %1345 = vmatpush1.bf16.xpose.msra.mxu0 %v1189_v48 }
 0x1c6   : > { %v980_v62 = vmul.f32 %v2522_v58, %v629_v4  ;;  %v982_v53 = vmul.f32 %v2524_v59, %v822_v51  ;;  %v631_v61 = vpop.f32.mrb[46].mxu0  ;;  %v824_v60 = vpop.f32.mrb[46].mxu1 }
 0x1c7   : > { %1107 = vst [vmem:[#allocation9 + $0x2c0] sm:$0xff] %v979_v63  ;;  %1109 = vst [vmem:[#allocation9 + $0x2d0] sm:$0xff] %v981_v50  ;;  %v983_v45 = vmul.f32 %v2518_v57, %v631_v61  ;;  %v985_v47 = vmul.f32 %v2520_v0, %v824_v60  ;;  %v633_v49 = vpop.f32.mrb[47].mxu0  ;;  %v826_v6 = vpop.f32.mrb[47].mxu1 }
 0x1c8   : > { %1108 = vst [vmem:[#allocation9 + $0x2c8] sm:$0xff] %v980_v62  ;;  %1110 = vst [vmem:[#allocation9 + $0x2d8] sm:$0xff] %v982_v53  ;;  %v984_v52 = vmul.f32 %v2522_v58, %v633_v49  ;;  %v986_v55 = vmul.f32 %v2524_v59, %v826_v6 }
 0x1c9   : > { %1111 = vst [vmem:[#allocation9 + $0x2e0] sm:$0xff] %v983_v45  ;;  %v1191_v48 = vpack.c.bf16 %v983_v45, %v979_v63  ;;  %1113 = vst [vmem:[#allocation9 + $0x2f0] sm:$0xff] %v985_v47  ;;  %v1193_v46 = vpack.c.bf16 %v985_v47, %v981_v50 }
 0x1ca   : > { %1112 = vst [vmem:[#allocation9 + $0x2e8] sm:$0xff] %v984_v52  ;;  %v1192_v54 = vpack.c.bf16 %v984_v52, %v980_v62  ;;  %1114 = vst [vmem:[#allocation9 + $0x2f8] sm:$0xff] %v986_v55  ;;  %v1194_v56 = vpack.c.bf16 %v986_v55, %v982_v53 }
 0x1cc   : > { %v637_v44 = vpop.f32.mrb[48].mxu0  ;;  %v830_v4 = vpop.f32.mrb[48].mxu1  ;;  %1233 = vmatprep.subr.bf16.mxu1 %v1192_v54  ;;  %1346 = vmatprep.subr.bf16.mxu0 %v1194_v56 }
 0x1cd   : > { %v987_v51 = vmul.f32 %v2518_v57, %v637_v44  ;;  %v989_v61 = vmul.f32 %v2520_v0, %v830_v4  ;;  %v639_v60 = vpop.f32.mrb[49].mxu0  ;;  %v832_v49 = vpop.f32.mrb[49].mxu1  ;;  %1234 = vmatpush1.bf16.xpose.msra.mxu1 %v1191_v48  ;;  %1347 = vmatpush1.bf16.xpose.msra.mxu0 %v1193_v46 }
 0x1ce   : > { %v988_v63 = vmul.f32 %v2522_v58, %v639_v60  ;;  %v990_v50 = vmul.f32 %v2524_v59, %v832_v49  ;;  %v641_v45 = vpop.f32.mrb[50].mxu0  ;;  %v834_v62 = vpop.f32.mrb[50].mxu1 }
 0x1cf   : > { %1115 = vst [vmem:[#allocation9 + $0x300] sm:$0xff] %v987_v51  ;;  %1117 = vst [vmem:[#allocation9 + $0x310] sm:$0xff] %v989_v61  ;;  %v991_v53 = vmul.f32 %v2518_v57, %v641_v45  ;;  %v993_v47 = vmul.f32 %v2520_v0, %v834_v62  ;;  %v643_v6 = vpop.f32.mrb[51].mxu0  ;;  %v836_v52 = vpop.f32.mrb[51].mxu1 }
 0x1d0   : > { %1116 = vst [vmem:[#allocation9 + $0x308] sm:$0xff] %v988_v63  ;;  %1118 = vst [vmem:[#allocation9 + $0x318] sm:$0xff] %v990_v50  ;;  %v992_v55 = vmul.f32 %v2522_v58, %v643_v6  ;;  %v994_v48 = vmul.f32 %v2524_v59, %v836_v52 }
 0x1d1   : > { %1119 = vst [vmem:[#allocation9 + $0x320] sm:$0xff] %v991_v53  ;;  %v1195_v46 = vpack.c.bf16 %v991_v53, %v987_v51  ;;  %1121 = vst [vmem:[#allocation9 + $0x330] sm:$0xff] %v993_v47  ;;  %v1197_v54 = vpack.c.bf16 %v993_v47, %v989_v61 }
 0x1d2   : > { %1120 = vst [vmem:[#allocation9 + $0x328] sm:$0xff] %v992_v55  ;;  %v1196_v56 = vpack.c.bf16 %v992_v55, %v988_v63  ;;  %1122 = vst [vmem:[#allocation9 + $0x338] sm:$0xff] %v994_v48  ;;  %v1198_v44 = vpack.c.bf16 %v994_v48, %v990_v50 }
 0x1d4   : > { %v647_v4 = vpop.f32.mrb[52].mxu0  ;;  %v840_v60 = vpop.f32.mrb[52].mxu1  ;;  %1235 = vmatprep.subr.bf16.mxu1 %v1196_v56  ;;  %1348 = vmatprep.subr.bf16.mxu0 %v1198_v44 }
 0x1d5   : > { %v995_v49 = vmul.f32 %v2518_v57, %v647_v4  ;;  %v997_v45 = vmul.f32 %v2520_v0, %v840_v60  ;;  %v649_v62 = vpop.f32.mrb[53].mxu0  ;;  %v842_v6 = vpop.f32.mrb[53].mxu1  ;;  %1236 = vmatpush1.bf16.xpose.msra.mxu1 %v1195_v46  ;;  %1349 = vmatpush1.bf16.xpose.msra.mxu0 %v1197_v54 }
 0x1d6   : > { %v996_v51 = vmul.f32 %v2522_v58, %v649_v62  ;;  %v998_v61 = vmul.f32 %v2524_v59, %v842_v6  ;;  %v651_v53 = vpop.f32.mrb[54].mxu0  ;;  %v844_v63 = vpop.f32.mrb[54].mxu1 }
 0x1d7   : > { %1123 = vst [vmem:[#allocation9 + $0x340] sm:$0xff] %v995_v49  ;;  %1125 = vst [vmem:[#allocation9 + $0x350] sm:$0xff] %v997_v45  ;;  %v999_v50 = vmul.f32 %v2518_v57, %v651_v53  ;;  %v1001_v47 = vmul.f32 %v2520_v0, %v844_v63  ;;  %v653_v52 = vpop.f32.mrb[55].mxu0  ;;  %v846_v55 = vpop.f32.mrb[55].mxu1 }
 0x1d8   : > { %1124 = vst [vmem:[#allocation9 + $0x348] sm:$0xff] %v996_v51  ;;  %1126 = vst [vmem:[#allocation9 + $0x358] sm:$0xff] %v998_v61  ;;  %v1000_v48 = vmul.f32 %v2522_v58, %v653_v52  ;;  %v1002_v46 = vmul.f32 %v2524_v59, %v846_v55 }
 0x1d9   : > { %1127 = vst [vmem:[#allocation9 + $0x360] sm:$0xff] %v999_v50  ;;  %v1199_v54 = vpack.c.bf16 %v999_v50, %v995_v49  ;;  %1129 = vst [vmem:[#allocation9 + $0x370] sm:$0xff] %v1001_v47  ;;  %v1201_v56 = vpack.c.bf16 %v1001_v47, %v997_v45 }
 0x1da   : > { %1128 = vst [vmem:[#allocation9 + $0x368] sm:$0xff] %v1000_v48  ;;  %v1200_v44 = vpack.c.bf16 %v1000_v48, %v996_v51  ;;  %1130 = vst [vmem:[#allocation9 + $0x378] sm:$0xff] %v1002_v46  ;;  %v1202_v4 = vpack.c.bf16 %v1002_v46, %v998_v61 }
 0x1dc   : > { %v657_v60 = vpop.f32.mrb[56].mxu0  ;;  %v850_v62 = vpop.f32.mrb[56].mxu1  ;;  %1237 = vmatprep.subr.bf16.mxu1 %v1200_v44  ;;  %1350 = vmatprep.subr.bf16.mxu0 %v1202_v4 }
 0x1dd   : > { %v1003_v6 = vmul.f32 %v2518_v57, %v657_v60  ;;  %v1005_v53 = vmul.f32 %v2520_v0, %v850_v62  ;;  %v659_v63 = vpop.f32.mrb[57].mxu0  ;;  %v852_v52 = vpop.f32.mrb[57].mxu1  ;;  %1238 = vmatpush1.bf16.xpose.msra.mxu1 %v1199_v54  ;;  %1351 = vmatpush1.bf16.xpose.msra.mxu0 %v1201_v56 }
 0x1de   : > { %v1004_v49 = vmul.f32 %v2522_v58, %v659_v63  ;;  %v1006_v45 = vmul.f32 %v2524_v59, %v852_v52  ;;  %v661_v50 = vpop.f32.mrb[58].mxu0  ;;  %v854_v51 = vpop.f32.mrb[58].mxu1 }
 0x1df   : > { %1131 = vst [vmem:[#allocation9 + $0x380] sm:$0xff] %v1003_v6  ;;  %1133 = vst [vmem:[#allocation9 + $0x390] sm:$0xff] %v1005_v53  ;;  %v1007_v61 = vmul.f32 %v2518_v57, %v661_v50  ;;  %v1009_v47 = vmul.f32 %v2520_v0, %v854_v51  ;;  %v663_v55 = vpop.f32.mrb[59].mxu0  ;;  %v856_v48 = vpop.f32.mrb[59].mxu1 }
 0x1e0   : > { %1132 = vst [vmem:[#allocation9 + $0x388] sm:$0xff] %v1004_v49  ;;  %1134 = vst [vmem:[#allocation9 + $0x398] sm:$0xff] %v1006_v45  ;;  %v1008_v46 = vmul.f32 %v2522_v58, %v663_v55  ;;  %v1010_v54 = vmul.f32 %v2524_v59, %v856_v48 }
 0x1e1   : > { %1135 = vst [vmem:[#allocation9 + $0x3a0] sm:$0xff] %v1007_v61  ;;  %v1203_v56 = vpack.c.bf16 %v1007_v61, %v1003_v6  ;;  %1137 = vst [vmem:[#allocation9 + $0x3b0] sm:$0xff] %v1009_v47  ;;  %v1205_v44 = vpack.c.bf16 %v1009_v47, %v1005_v53 }
 0x1e2   : > { %1136 = vst [vmem:[#allocation9 + $0x3a8] sm:$0xff] %v1008_v46  ;;  %v1204_v4 = vpack.c.bf16 %v1008_v46, %v1004_v49  ;;  %1138 = vst [vmem:[#allocation9 + $0x3b8] sm:$0xff] %v1010_v54  ;;  %v1206_v60 = vpack.c.bf16 %v1010_v54, %v1006_v45 }
 0x1e4   : > { %v667_v62 = vpop.f32.mrb[60].mxu0  ;;  %v860_v63 = vpop.f32.mrb[60].mxu1  ;;  %1239 = vmatprep.subr.bf16.mxu1 %v1204_v4  ;;  %1352 = vmatprep.subr.bf16.mxu0 %v1206_v60 }
 0x1e5   : > { %v1011_v52 = vmul.f32 %v2518_v57, %v667_v62  ;;  %v1013_v50 = vmul.f32 %v2520_v0, %v860_v63  ;;  %v669_v51 = vpop.f32.mrb[61].mxu0  ;;  %v862_v55 = vpop.f32.mrb[61].mxu1  ;;  %1240 = vmatpush1.bf16.xpose.msra.mxu1 %v1203_v56  ;;  %1353 = vmatpush1.bf16.xpose.msra.mxu0 %v1205_v44 }
 0x1e6   : > { %v1012_v6 = vmul.f32 %v2522_v58, %v669_v51  ;;  %v1014_v53 = vmul.f32 %v2524_v59, %v862_v55  ;;  %v671_v61 = vpop.f32.mrb[62].mxu0  ;;  %v864_v49 = vpop.f32.mrb[62].mxu1 }
 0x1e7   : > { %1139 = vst [vmem:[#allocation9 + $0x3c0] sm:$0xff] %v1011_v52  ;;  %1141 = vst [vmem:[#allocation9 + $0x3d0] sm:$0xff] %v1013_v50  ;;  %v1015_v45 = vmul.f32 %v2518_v57, %v671_v61  ;;  %v1017_v47 = vmul.f32 %v2520_v0, %v864_v49  ;;  %v673_v48 = vpop.f32.mrb[63].mxu0  ;;  %v866_v46 = vpop.f32.mrb[63].mxu1 }
 0x1e8   : > { %1140 = vst [vmem:[#allocation9 + $0x3c8] sm:$0xff] %v1012_v6  ;;  %1142 = vst [vmem:[#allocation9 + $0x3d8] sm:$0xff] %v1014_v53  ;;  %v1016_v54 = vmul.f32 %v2522_v58, %v673_v48  ;;  %v1018_v56 = vmul.f32 %v2524_v59, %v866_v46 }
 0x1e9   : > { %1143 = vst [vmem:[#allocation9 + $0x3e0] sm:$0xff] %v1015_v45  ;;  %v1207_v44 = vpack.c.bf16 %v1015_v45, %v1011_v52  ;;  %1145 = vst [vmem:[#allocation9 + $0x3f0] sm:$0xff] %v1017_v47  ;;  %v1209_v4 = vpack.c.bf16 %v1017_v47, %v1013_v50 }
 0x1ea   : > { %1144 = vst [vmem:[#allocation9 + $0x3e8] sm:$0xff] %v1016_v54  ;;  %v1208_v60 = vpack.c.bf16 %v1016_v54, %v1012_v6  ;;  %1146 = vst [vmem:[#allocation9 + $0x3f8] sm:$0xff] %v1018_v56  ;;  %v1210_v62 = vpack.c.bf16 %v1018_v56, %v1014_v53 }
 0x1ec   : > { %1241 = vmatprep.subr.bf16.mxu1 %v1208_v60  ;;  %1354 = vmatprep.subr.bf16.mxu0 %v1210_v62 }
 0x1ed   : > { %1242 = vmatpush1.bf16.xpose.msra.mxu1 %v1207_v44  ;;  %1355 = vmatpush1.bf16.xpose.msra.mxu0 %v1209_v4 }
 0x1f4   : > { %1244 = vmatmul.mubr.bf16.vlgmr.msra.gmra.mrb[64].mxu1 %v323_v9  ;;  %1357 = vmatmul.mubr.bf16.vlgmr.msra.gmra.mrb[64].mxu0 %v325_v10 }
 0x1f5   : > { %1253 = vmatprep.mubr.bf16.mxu1 %v328_v5  ;;  %1366 = vmatprep.mubr.bf16.mxu0 %v330_v7  ;;  %v2915_v5 = vunpack.c.h.s8.bf16 %v2451_v41  ;;  %v2916_v7 = vunpack.c.h.s8.bf16 %v2454_v42 }
 0x1fc   : > { %1254 = vmatmul.mubr.bf16.gmra.mrb[68].mxu1 %v327_v13  ;;  %1367 = vmatmul.mubr.bf16.gmra.mrb[68].mxu0 %v329_v14 }
 0x1fd   : > { %1263 = vmatprep.mubr.bf16.mxu1 %v332_v16  ;;  %1376 = vmatprep.mubr.bf16.mxu0 %v334_v17 }
 0x204   : > { %1264 = vmatmul.mubr.bf16.gmra.mrb[72].mxu1 %v331_v19  ;;  %1377 = vmatmul.mubr.bf16.gmra.mrb[72].mxu0 %v333_v20 }
 0x205   : > { %1273 = vmatprep.mubr.bf16.mxu1 %v336_v21  ;;  %1386 = vmatprep.mubr.bf16.mxu0 %v338_v22 }
 0x20c   : > { %1274 = vmatmul.mubr.bf16.gmra.mrb[76].mxu1 %v335_v25  ;;  %1387 = vmatmul.mubr.bf16.gmra.mrb[76].mxu0 %v337_v26 }
 0x20d   : > { %1283 = vmatprep.mubr.bf16.mxu1 %v340_v28  ;;  %1396 = vmatprep.mubr.bf16.mxu0 %v342_v29 }
 0x214   : > { %1284 = vmatmul.mubr.bf16.gmra.mrb[80].mxu1 %v339_v31  ;;  %1397 = vmatmul.mubr.bf16.gmra.mrb[80].mxu0 %v341_v32 }
 0x215   : > { %1293 = vmatprep.mubr.bf16.mxu1 %v344_v33  ;;  %1406 = vmatprep.mubr.bf16.mxu0 %v346_v34 }
 0x21c   : > { %1294 = vmatmul.mubr.bf16.gmra.mrb[84].mxu1 %v343_v37  ;;  %1407 = vmatmul.mubr.bf16.gmra.mrb[84].mxu0 %v345_v38 }
 0x21d   : > { %1303 = vmatprep.mubr.bf16.mxu1 %v348_v39  ;;  %1416 = vmatprep.mubr.bf16.mxu0 %v350_v40 }
 0x224   : > { %1304 = vmatmul.mubr.bf16.gmra.mrb[88].mxu1 %v347_v43  ;;  %1417 = vmatmul.mubr.bf16.gmra.mrb[88].mxu0 %v2912_v1 }
 0x225   : > { %1313 = vmatprep.mubr.bf16.mxu1 %v2913_v2  ;;  %1426 = vmatprep.mubr.bf16.mxu0 %v2914_v3 }
 0x22c   : > { %1314 = vmatmul.mubr.bf16.gmra.mrb[92].mxu1 %v2915_v5  ;;  %1427 = vmatmul.mubr.bf16.gmra.mrb[92].mxu0 %v2916_v7 }
 0x2c7   : > { %v1245_v8 = vpop.f32.mrb[64].mxu1  ;;  %v1358_v9 = vpop.f32.mrb[64].mxu0 }
 0x2c8   : > { %v2715_v10 = vadd.f32 %v1358_v9, %v1245_v8  ;;  %v1247_v11 = vpop.f32.mrb[65].mxu1  ;;  %v1360_v12 = vpop.f32.mrb[65].mxu0 }
 0x2c9   : > { %v2717_v13 = vadd.f32 %v1360_v12, %v1247_v11  ;;  %v1249_v14 = vpop.f32.mrb[66].mxu1  ;;  %v1362_v15 = vpop.f32.mrb[66].mxu0 }
 0x2ca   : > { %v2719_v16 = vadd.f32 %v1362_v15, %v1249_v14  ;;  %v1251_v17 = vpop.f32.mrb[67].mxu1  ;;  %v1364_v18 = vpop.f32.mrb[67].mxu0 }
 0x2cb   : > { %v2721_v19 = vadd.f32 %v1364_v18, %v1251_v17 }
 0x2cf   : > { %v1255_v20 = vpop.f32.mrb[68].mxu1  ;;  %v1368_v21 = vpop.f32.mrb[68].mxu0 }
 0x2d0   : > { %v2723_v22 = vadd.f32 %v1368_v21, %v1255_v20  ;;  %v1257_v23 = vpop.f32.mrb[69].mxu1  ;;  %v1370_v24 = vpop.f32.mrb[69].mxu0 }
 0x2d1   : > { %v2725_v25 = vadd.f32 %v1370_v24, %v1257_v23  ;;  %v1259_v26 = vpop.f32.mrb[70].mxu1  ;;  %v1372_v27 = vpop.f32.mrb[70].mxu0 }
 0x2d2   : > { %v2727_v28 = vadd.f32 %v1372_v27, %v1259_v26  ;;  %v1261_v29 = vpop.f32.mrb[71].mxu1  ;;  %v1374_v30 = vpop.f32.mrb[71].mxu0 }
 0x2d3   : > { %v2729_v31 = vadd.f32 %v1374_v30, %v1261_v29 }
 0x2d7   : > { %v1265_v32 = vpop.f32.mrb[72].mxu1  ;;  %v1378_v33 = vpop.f32.mrb[72].mxu0 }
 0x2d8   : > { %v2731_v34 = vadd.f32 %v1378_v33, %v1265_v32  ;;  %v1267_v35 = vpop.f32.mrb[73].mxu1  ;;  %v1380_v36 = vpop.f32.mrb[73].mxu0 }
 0x2d9   : > { %v2733_v37 = vadd.f32 %v1380_v36, %v1267_v35  ;;  %v1269_v38 = vpop.f32.mrb[74].mxu1  ;;  %v1382_v39 = vpop.f32.mrb[74].mxu0 }
 0x2da   : > { %v2735_v40 = vadd.f32 %v1382_v39, %v1269_v38  ;;  %v1271_v41 = vpop.f32.mrb[75].mxu1  ;;  %v1384_v42 = vpop.f32.mrb[75].mxu0 }
 0x2db   : > { %v2737_v43 = vadd.f32 %v1384_v42, %v1271_v41 }
 0x2df   : > { %v1275_v57 = vpop.f32.mrb[76].mxu1  ;;  %v1388_v0 = vpop.f32.mrb[76].mxu0 }
 0x2e0   : > { %v2739_v58 = vadd.f32 %v1388_v0, %v1275_v57  ;;  %v1277_v59 = vpop.f32.mrb[77].mxu1  ;;  %v1390_v63 = vpop.f32.mrb[77].mxu0 }
 0x2e1   : > { %v2741_v52 = vadd.f32 %v1390_v63, %v1277_v59  ;;  %v1279_v50 = vpop.f32.mrb[78].mxu1  ;;  %v1392_v51 = vpop.f32.mrb[78].mxu0 }
 0x2e2   : > { %v2743_v55 = vadd.f32 %v1392_v51, %v1279_v50  ;;  %v1281_v6 = vpop.f32.mrb[79].mxu1  ;;  %v1394_v53 = vpop.f32.mrb[79].mxu0 }
 0x2e3   : > { %v2745_v61 = vadd.f32 %v1394_v53, %v1281_v6 }
 0x2e7   : > { %v1285_v49 = vpop.f32.mrb[80].mxu1  ;;  %v1398_v45 = vpop.f32.mrb[80].mxu0 }
 0x2e8   : > { %v2747_v47 = vadd.f32 %v1398_v45, %v1285_v49  ;;  %v1287_v48 = vpop.f32.mrb[81].mxu1  ;;  %v1400_v46 = vpop.f32.mrb[81].mxu0  ;;  %v2119_v49 = vmov (%p1438_p10), 0.0  }
 0x2e9   : > { %v2749_v54 = vadd.f32 %v1400_v46, %v1287_v48  ;;  %v1289_v56 = vpop.f32.mrb[82].mxu1  ;;  %v1402_v44 = vpop.f32.mrb[82].mxu0  ;;  %1443 = vst [vmem:[#allocation8] sm:$0xff] (%p1438_p10), %v2119_v49  ;;  %1444 = vst [vmem:[#allocation8 + $0x8] sm:$0xff] (%p1438_p10), %v2119_v49 }
 0x2ea   : > { %v2751_v4 = vadd.f32 %v1402_v44, %v1289_v56  ;;  %v1291_v60 = vpop.f32.mrb[83].mxu1  ;;  %v1404_v62 = vpop.f32.mrb[83].mxu0  ;;  %1445 = vst [vmem:[#allocation8 + $0x10] sm:$0xff] (%p1438_p10), %v2119_v49  ;;  %1446 = vst [vmem:[#allocation8 + $0x18] sm:$0xff] (%p1438_p10), %v2119_v49 }
 0x2eb   : > { %v2753_v1 = vadd.f32 %v1404_v62, %v1291_v60  ;;  %1447 = vst [vmem:[#allocation8 + $0x20] sm:$0xff] (%p1438_p10), %v2119_v49  ;;  %1448 = vst [vmem:[#allocation8 + $0x28] sm:$0xff] (%p1438_p10), %v2119_v49 }
 0x2ec   : > { %1449 = vst [vmem:[#allocation8 + $0x30] sm:$0xff] (%p1438_p10), %v2119_v49  ;;  %1450 = vst [vmem:[#allocation8 + $0x38] sm:$0xff] (%p1438_p10), %v2119_v49 }
 0x2ed   : > { %1451 = vst [vmem:[#allocation8 + $0x40] sm:$0xff] (%p1438_p10), %v2119_v49  ;;  %1452 = vst [vmem:[#allocation8 + $0x48] sm:$0xff] (%p1438_p10), %v2119_v49 }
 0x2ee   : > { %1453 = vst [vmem:[#allocation8 + $0x50] sm:$0xff] (%p1438_p10), %v2119_v49  ;;  %1454 = vst [vmem:[#allocation8 + $0x58] sm:$0xff] (%p1438_p10), %v2119_v49 }
 0x2ef   : > { %v1295_v2 = vpop.f32.mrb[84].mxu1  ;;  %v1408_v3 = vpop.f32.mrb[84].mxu0  ;;  %1455 = vst [vmem:[#allocation8 + $0x60] sm:$0xff] (%p1438_p10), %v2119_v49  ;;  %1456 = vst [vmem:[#allocation8 + $0x68] sm:$0xff] (%p1438_p10), %v2119_v49 }
 0x2f0   : > { %v2755_v5 = vadd.f32 %v1408_v3, %v1295_v2  ;;  %v1297_v7 = vpop.f32.mrb[85].mxu1  ;;  %v1410_v8 = vpop.f32.mrb[85].mxu0  ;;  %1457 = vst [vmem:[#allocation8 + $0x70] sm:$0xff] (%p1438_p10), %v2119_v49  ;;  %1458 = vst [vmem:[#allocation8 + $0x78] sm:$0xff] (%p1438_p10), %v2119_v49 }
 0x2f1   : > { %v2757_v9 = vadd.f32 %v1410_v8, %v1297_v7  ;;  %v1299_v11 = vpop.f32.mrb[86].mxu1  ;;  %v1412_v12 = vpop.f32.mrb[86].mxu0  ;;  %1459 = vst [vmem:[#allocation8 + $0x80] sm:$0xff] (%p1438_p10), %v2119_v49  ;;  %1460 = vst [vmem:[#allocation8 + $0x88] sm:$0xff] (%p1438_p10), %v2119_v49 }
 0x2f2   : > { %v2759_v14 = vadd.f32 %v1412_v12, %v1299_v11  ;;  %v1301_v15 = vpop.f32.mrb[87].mxu1  ;;  %v1414_v17 = vpop.f32.mrb[87].mxu0  ;;  %1461 = vst [vmem:[#allocation8 + $0x90] sm:$0xff] (%p1438_p10), %v2119_v49  ;;  %1462 = vst [vmem:[#allocation8 + $0x98] sm:$0xff] (%p1438_p10), %v2119_v49 }
 0x2f3   : > { %v2761_v18 = vadd.f32 %v1414_v17, %v1301_v15  ;;  %1463 = vst [vmem:[#allocation8 + $0xa0] sm:$0xff] (%p1438_p10), %v2119_v49  ;;  %1464 = vst [vmem:[#allocation8 + $0xa8] sm:$0xff] (%p1438_p10), %v2119_v49 }
 0x2f4   : > { %1465 = vst [vmem:[#allocation8 + $0xb0] sm:$0xff] (%p1438_p10), %v2119_v49  ;;  %1466 = vst [vmem:[#allocation8 + $0xb8] sm:$0xff] (%p1438_p10), %v2119_v49 }
 0x2f5   : > { %1467 = vst [vmem:[#allocation8 + $0xc0] sm:$0xff] (%p1438_p10), %v2119_v49  ;;  %1468 = vst [vmem:[#allocation8 + $0xc8] sm:$0xff] (%p1438_p10), %v2119_v49 }
 0x2f6   : > { %1469 = vst [vmem:[#allocation8 + $0xd0] sm:$0xff] (%p1438_p10), %v2119_v49  ;;  %1470 = vst [vmem:[#allocation8 + $0xd8] sm:$0xff] (%p1438_p10), %v2119_v49 }
 0x2f7   : > { %v1305_v20 = vpop.f32.mrb[88].mxu1  ;;  %v1418_v21 = vpop.f32.mrb[88].mxu0  ;;  %1471 = vst [vmem:[#allocation8 + $0xe0] sm:$0xff] (%p1438_p10), %v2119_v49  ;;  %1472 = vst [vmem:[#allocation8 + $0xe8] sm:$0xff] (%p1438_p10), %v2119_v49 }
 0x2f8   : > { %v2763_v23 = vadd.f32 %v1418_v21, %v1305_v20  ;;  %v1307_v24 = vpop.f32.mrb[89].mxu1  ;;  %v1420_v26 = vpop.f32.mrb[89].mxu0  ;;  %1473 = vst [vmem:[#allocation8 + $0xf0] sm:$0xff] (%p1438_p10), %v2119_v49  ;;  %1474 = vst [vmem:[#allocation8 + $0xf8] sm:$0xff] (%p1438_p10), %v2119_v49 }
 0x2f9   : > { %v2765_v27 = vadd.f32 %v1420_v26, %v1307_v24  ;;  %v1309_v29 = vpop.f32.mrb[90].mxu1  ;;  %v1422_v30 = vpop.f32.mrb[90].mxu0 }
 0x2fa   : > { %v2767_v32 = vadd.f32 %v1422_v30, %v1309_v29  ;;  %v1311_v33 = vpop.f32.mrb[91].mxu1  ;;  %v1424_v35 = vpop.f32.mrb[91].mxu0 }
 0x2fb   : > { %v2769_v36 = vadd.f32 %v1424_v35, %v1311_v33 }
 0x2fd   : > { %1442 = sbr.rel (!%p1438_p10) target bundleno = 772 (0x304), region = 48 }
 0x2ff   : > { %v1315_v38 = vpop.f32.mrb[92].mxu1  ;;  %v1428_v39 = vpop.f32.mrb[92].mxu0 }
 0x300   : > { %v2771_v41 = vadd.f32 %v1428_v39, %v1315_v38  ;;  %v1317_v42 = vpop.f32.mrb[93].mxu1  ;;  %v1430_v57 = vpop.f32.mrb[93].mxu0 }
 0x301   : > { %v2773_v0 = vadd.f32 %v1430_v57, %v1317_v42  ;;  %v1319_v59 = vpop.f32.mrb[94].mxu1  ;;  %v1432_v63 = vpop.f32.mrb[94].mxu0 }
 0x302   : > { %v2775_v50 = vadd.f32 %v1432_v63, %v1319_v59  ;;  %v1321_v51 = vpop.f32.mrb[95].mxu1  ;;  %v1434_v6 = vpop.f32.mrb[95].mxu0 }
 0x303   : > { %v2777_v53 = vadd.f32 %v1434_v6, %v1321_v51 }
 0x304 PF: > { %v1475_v45 = vld [vmem:[#allocation8] sm:$0xff]  ;;  %v1476_v48 = vld [vmem:[#allocation8 + $0x8] sm:$0xff]  ;;  %v1477_v46 = vld [vmem:[#allocation8 + $0x10] sm:$0xff]  ;;  %p1822_p5 = scmp.eq.s32.totalorder %s2239_s7, 2  ;;  %s2120_s18 = smov [#allocation9]  }
 0x305   : > { %v1507_v56 = vadd.f32 %v1475_v45, %v2715_v10  ;;  %v1508_v44 = vadd.f32 %v1476_v48, %v2717_v13  ;;  %v1509_v60 = vadd.f32 %v1477_v46, %v2719_v16  ;;  %v1478_v62 = vld [vmem:[#allocation8 + $0x18] sm:$0xff]  ;;  %v1479_v2 = vld [vmem:[#allocation8 + $0x20] sm:$0xff]  ;;  %v1480_v3 = vld [vmem:[#allocation8 + $0x28] sm:$0xff]  ;;  %s1599_s10 = sshll.u32 %s2120_s18, 4  ;;  %s2797_s10 = int_to_ptr.vmem [resolvable:$true] %s1599_s10 }
 0x306   : > { %v1510_v7 = vadd.f32 %v1478_v62, %v2721_v19  ;;  %v1511_v8 = vadd.f32 %v1479_v2, %v2723_v22  ;;  %v1512_v11 = vadd.f32 %v1480_v3, %v2725_v25  ;;  %v1481_v12 = vld [vmem:[#allocation8 + $0x30] sm:$0xff]  ;;  %v1482_v15 = vld [vmem:[#allocation8 + $0x38] sm:$0xff]  ;;  %v1483_v17 = vld [vmem:[#allocation8 + $0x40] sm:$0xff]  ;;  %s1991_s11 = scalar_lea.vmem %s2797_s10, 16384  ;;  %p1998_p7 = scmp.lt.s32.totalorder %s2797_s10, %s2797_s10 }
 0x307   : > { %1539 = vst [vmem:[#allocation8] sm:$0xff] %v1507_v56  ;;  %1540 = vst [vmem:[#allocation8 + $0x8] sm:$0xff] %v1508_v44  ;;  %v1513_v10 = vadd.f32 %v1481_v12, %v2727_v28  ;;  %v1514_v13 = vadd.f32 %v1482_v15, %v2729_v31  ;;  %v1515_v16 = vadd.f32 %v1483_v17, %v2731_v34  ;;  %v1484_v20 = vld [vmem:[#allocation8 + $0x48] sm:$0xff]  ;;  %v1485_v21 = vld [vmem:[#allocation8 + $0x50] sm:$0xff]  ;;  %p1992_p0 = scmp.ne.s32.totalorder %s2797_s10, %s1991_s11  ;;  %p1999_p13 = scmp.lt.s32.totalorder %s1991_s11, %s1991_s11 }
 0x308   : > { %1541 = vst [vmem:[#allocation8 + $0x10] sm:$0xff] %v1509_v60  ;;  %v1486_v19 = vld [vmem:[#allocation8 + $0x58] sm:$0xff]  ;;  %1542 = vst [vmem:[#allocation8 + $0x18] sm:$0xff] %v1510_v7  ;;  %v1516_v22 = vadd.f32 %v1484_v20, %v2733_v37  ;;  %v1517_v25 = vadd.f32 %v1485_v21, %v2735_v40  ;;  %v1487_v26 = vld [vmem:[#allocation8 + $0x60] sm:$0xff] }
 0x309   : > { %1543 = vst [vmem:[#allocation8 + $0x20] sm:$0xff] %v1511_v8  ;;  %1544 = vst [vmem:[#allocation8 + $0x28] sm:$0xff] %v1512_v11  ;;  %v1518_v24 = vadd.f32 %v1486_v19, %v2737_v43  ;;  %v1488_v29 = vld [vmem:[#allocation8 + $0x68] sm:$0xff]  ;;  %v1489_v30 = vld [vmem:[#allocation8 + $0x70] sm:$0xff]  ;;  %v1519_v28 = vadd.f32 %v1487_v26, %v2739_v58  ;;  %p1993_p1 = pnand %p1992_p0, %p1822_p5  ;;  %p2000_p6 = por %p1999_p13, %p1998_p7 }
 0x30a   : > { %1545 = vst [vmem:[#allocation8 + $0x30] sm:$0xff] %v1513_v10  ;;  %1546 = vst [vmem:[#allocation8 + $0x38] sm:$0xff] %v1514_v13  ;;  %v1520_v31 = vadd.f32 %v1488_v29, %v2741_v52  ;;  %v1521_v34 = vadd.f32 %v1489_v30, %v2743_v55  ;;  %v1490_v37 = vld [vmem:[#allocation8 + $0x78] sm:$0xff]  ;;  %v1491_v33 = vld [vmem:[#allocation8 + $0x80] sm:$0xff] }
 0x30b   : > { %1547 = vst [vmem:[#allocation8 + $0x40] sm:$0xff] %v1515_v16  ;;  %v1492_v40 = vld [vmem:[#allocation8 + $0x88] sm:$0xff]  ;;  %1548 = vst [vmem:[#allocation8 + $0x48] sm:$0xff] %v1516_v22  ;;  %v1522_v43 = vadd.f32 %v1490_v37, %v2745_v61  ;;  %v1523_v58 = vadd.f32 %v1491_v33, %v2747_v47  ;;  %v1493_v35 = vld [vmem:[#allocation8 + $0x90] sm:$0xff]  ;;  %p1994_p4 = pneg %p1993_p1 }
 0x30c   : > { %1549 = vst [vmem:[#allocation8 + $0x50] sm:$0xff] %v1517_v25  ;;  %1550 = vst [vmem:[#allocation8 + $0x58] sm:$0xff] %v1518_v24  ;;  %v1524_v52 = vadd.f32 %v1492_v40, %v2749_v54  ;;  %v1494_v55 = vld [vmem:[#allocation8 + $0x98] sm:$0xff]  ;;  %v1495_v38 = vld [vmem:[#allocation8 + $0xa0] sm:$0xff] }
 0x30d   : > { %p2001_p3 = pnand %p2000_p6, %p1994_p4 }
 0x30f   : > { %2004 = shalt.err (!%p2001_p3)
}
 0x310   : > { %s2005_s30 = scalar_lea.hbm %s2887_s4, 16384 }
 0x311   : > { %p2006_p9 = scmp.ne.s32.totalorder %s2887_s4, %s2005_s30  ;;  %p2011_p12 = scmp.lt.u32.totalorder %s2005_s30, %s2887_s4 }
 0x313   : > { %p2007_p2 = pnand %p2006_p9, %p1822_p5 }
 0x315   : > { %p2008_p11 = pneg %p2007_p2 }
 0x317   : > { %p2013_p8 = pnand %p2011_p12, %p2008_p11 }
 0x319   : > { %2016 = shalt.err (!%p2013_p8)
}
 0x31a   : > { %s2121_s12 = smov 512   ;;  %s2122_s13 = smov 32   ;;  %1551 = vst [vmem:[#allocation8 + $0x60] sm:$0xff] %v1519_v28  ;;  %1552 = vst [vmem:[#allocation8 + $0x68] sm:$0xff] %v1520_v31  ;;  %v1525_v61 = vadd.f32 %v1493_v35, %v2751_v4  ;;  %v1526_v47 = vadd.f32 %v1494_v55, %v2753_v1  ;;  %v1527_v54 = vadd.f32 %v1495_v38, %v2755_v5  ;;  %v1496_v39 = vld [vmem:[#allocation8 + $0xa8] sm:$0xff]  ;;  %v1497_v42 = vld [vmem:[#allocation8 + $0xb0] sm:$0xff] }
 0x31b   : > { %1803 = dma.vmem_to_hbm [thread:$0]  (%p1822_p5), %s2797_s10, 16384, %s2887_s4, [#allocation10], %s2121_s12, %s2121_s12, %s2122_s13   ;;  %1553 = vst [vmem:[#allocation8 + $0x70] sm:$0xff] %v1521_v34  ;;  %v1498_v57 = vld [vmem:[#allocation8 + $0xb8] sm:$0xff]  ;;  %1554 = vst [vmem:[#allocation8 + $0x78] sm:$0xff] %v1522_v43  ;;  %v1528_v59 = vadd.f32 %v1496_v39, %v2757_v9  ;;  %v1529_v63 = vadd.f32 %v1497_v42, %v2759_v14  ;;  %v1499_v6 = vld [vmem:[#allocation8 + $0xc0] sm:$0xff] }
 0x31c   : > { %1555 = vst [vmem:[#allocation8 + $0x80] sm:$0xff] %v1523_v58  ;;  %1556 = vst [vmem:[#allocation8 + $0x88] sm:$0xff] %v1524_v52  ;;  %v1530_v51 = vadd.f32 %v1498_v57, %v2761_v18  ;;  %v1500_v49 = vld [vmem:[#allocation8 + $0xc8] sm:$0xff]  ;;  %v1501_v45 = vld [vmem:[#allocation8 + $0xd0] sm:$0xff]  ;;  %s2123_s23 = smov [#allocation8]   ;;  %v1531_v4 = vadd.f32 %v1499_v6, %v2763_v23 }
 0x31d   : > { %s1580_s24 = sshll.u32 %s2123_s23, 4  ;;  %1557 = vst [vmem:[#allocation8 + $0x90] sm:$0xff] %v1525_v61  ;;  %1558 = vst [vmem:[#allocation8 + $0x98] sm:$0xff] %v1526_v47  ;;  %v1532_v1 = vadd.f32 %v1500_v49, %v2765_v27  ;;  %v1533_v5 = vadd.f32 %v1501_v45, %v2767_v32  ;;  %v1502_v48 = vld [vmem:[#allocation8 + $0xd8] sm:$0xff]  ;;  %v1503_v9 = vld [vmem:[#allocation8 + $0xe0] sm:$0xff]  ;;  %s1581_s24 = int_to_ptr.vmem [resolvable:$true] %s1580_s24 }
 0x31e   : > { %1559 = vst [vmem:[#allocation8 + $0xa0] sm:$0xff] %v1527_v54  ;;  %v1504_v46 = vld [vmem:[#allocation8 + $0xe8] sm:$0xff]  ;;  %1560 = vst [vmem:[#allocation8 + $0xa8] sm:$0xff] %v1528_v59  ;;  %v1534_v14 = vadd.f32 %v1502_v48, %v2769_v36  ;;  %v1535_v18 = vadd.f32 %v1503_v9, %v2771_v41  ;;  %v1505_v44 = vld [vmem:[#allocation8 + $0xf0] sm:$0xff]  ;;  %s2017_s28 = scalar_lea.vmem %s1581_s24, 4096  ;;  %p2024_p4 = scmp.lt.s32.totalorder %s1581_s24, %s1581_s24 }
 0x31f   : > { %1561 = vst [vmem:[#allocation8 + $0xb0] sm:$0xff] %v1529_v63  ;;  %1562 = vst [vmem:[#allocation8 + $0xb8] sm:$0xff] %v1530_v51  ;;  %v1536_v56 = vadd.f32 %v1504_v46, %v2773_v0  ;;  %v1506_v60 = vld [vmem:[#allocation8 + $0xf8] sm:$0xff]  ;;  %v1537_v23 = vadd.f32 %v1505_v44, %v2775_v50  ;;  %p2018_p10 = scmp.ne.s32.totalorder %s1581_s24, %s2017_s28  ;;  %p2025_p7 = scmp.lt.s32.totalorder %s2017_s28, %s2017_s28 }
 0x320   : > { %1563 = vst [vmem:[#allocation8 + $0xc0] sm:$0xff] %v1531_v4  ;;  %1564 = vst [vmem:[#allocation8 + $0xc8] sm:$0xff] %v1532_v1  ;;  %v1538_v27 = vadd.f32 %v1506_v60, %v2777_v53 }
 0x321   : > { %1565 = vst [vmem:[#allocation8 + $0xd0] sm:$0xff] %v1533_v5  ;;  %1566 = vst [vmem:[#allocation8 + $0xd8] sm:$0xff] %v1534_v14  ;;  %p2019_p0 = pnand %p2018_p10, %p1822_p5  ;;  %p2026_p13 = por %p2025_p7, %p2024_p4 }
 0x322   : > { %1567 = vst [vmem:[#allocation8 + $0xe0] sm:$0xff] %v1535_v18  ;;  %1568 = vst [vmem:[#allocation8 + $0xe8] sm:$0xff] %v1536_v56 }
 0x323   : > { %1569 = vst [vmem:[#allocation8 + $0xf0] sm:$0xff] %v1537_v23  ;;  %1570 = vst [vmem:[#allocation8 + $0xf8] sm:$0xff] %v1538_v27  ;;  %p2020_p1 = pneg %p2019_p0 }
 0x325   : > { %p2027_p6 = pnand %p2026_p13, %p2020_p1 }
 0x327   : > { %2030 = shalt.err (!%p2027_p6)
}
 0x328   : > { %s2031_s9 = scalar_lea.hbm %s2886_s3, 4096 }
 0x329   : > { %p2032_p3 = scmp.ne.s32.totalorder %s2886_s3, %s2031_s9  ;;  %p2037_p11 = scmp.lt.u32.totalorder %s2031_s9, %s2886_s3 }
 0x32b   : > { %p2033_p9 = pnand %p2032_p3, %p1822_p5 }
 0x32d   : > { %p2034_p2 = pneg %p2033_p9 }
 0x32f   : > { %p2039_p12 = pnand %p2037_p11, %p2034_p2 }
 0x331   : > { %2042 = shalt.err (!%p2039_p12)
}
 0x332   : > { %s2124_s26 = smov 256   ;;  %s2125_s30 = smov 16  }
 0x333   : > { %1801 = dma.vmem_to_hbm [thread:$0]  (%p1822_p5), %s1581_s24, 4096, %s2886_s3, [#allocation4], %s2124_s26, %s2124_s26, %s2125_s30  }
 0x334   : > { %2080 = dma.done.wait (%p1822_p5), [#allocation4], 4096  }
 0x335   : > { %2082 = vsyncadd (%p1822_p5), [#allocation4], 4294963200 }
 0x336   : > { %2084 = dma.done.wait (%p1822_p5), [#allocation10], 16384  }
 0x337   : > { %2086 = vsyncadd (%p1822_p5), [#allocation10], 4294950912 }
 0x338 PF: > { %s21_s20 = sadd.s32 1, %s2109_s20   ;;  %s2917_s15 = smov %s2093_s16 }
 0x339   : > { %p18_p8 = scmp.ge.s32.totalorder %s21_s20, 5   ;;  %s2918_s16 = smov %s2097_s17 }
 0x33a   : > { %s2919_s17 = smov %s2195_s27  ;;  %s2920_s18 = smov %s2105_s19 }
 0x33b   : > { %s2921_s19 = smov %s2923_s21  ;;  %20 = sbr.rel (!%p18_p8) target bundleno = 9 (0x9), region = 99 }
 0x342   :  { %1619 = vsyncpa [#allocation3], 1 }
 0x343   :  { %1621 = vsyncpa [#allocation3 + $0x1], 1 }
 0x344   :  { %1622 = vsyncpa [#allocation6], 1 }
 0x345   :  { %1623 = vsyncpa [#allocation4], 1 }
 0x346   :  { %1625 = vsyncpa [#allocation4 + $0x1], 1 }
 0x347   :  { %1626 = vsyncpa [#allocation10], 1 }

</bundles_post_ra>
